<compile_context>
chip_gen: v7x
topology: tpu7x:2x2x1
jax: 0.10.0
libtpu: 0.0.40
codegen_flags: <defaults>
</compile_context>

<pallas_src>
import math

import jax
import jax.numpy as jnp
from jax.experimental import pallas as pl
from jax.experimental.pallas import tpu as pltpu

# ---------------- configuration (small synthetic generator) ------------------
Z_DIM = 32          # z_dim == w_dim
W_DIM = 32
NUM_WS = 4          # number of per-layer ws (forward broadcasts one w to all)
C0 = 32             # channels of the learned constant input
C1 = 32             # channels after the styled convs
H = 8
W = 8
HW = H * W
IMG_C = 3
MAX_B_TILE = 256                  # samples folded into one grid step (mult of 8)
VMEM_LIMIT = 48 * 1024 * 1024     # > 32 MiB scoped default, < v7x 64 MiB physical


def _round_up(x, m):
    return ((x + m - 1) // m) * m


def _synthesis_kernel(w_ref, const_ref, aff_ref, conv_ref, wsq_ref, rgb_ref,
                      out_ref):
    """One batch tile per grid step.

    w_ref     : (BT, W_DIM)         latents for this tile
    const_ref : (HW, C0)            learned constant input (shared)
    aff_ref   : (W_DIM+1, 3*C1)     fused style affines; rows 0..31 = weights
                                    [layer0 | layer1 | rgb], row 32 = biases
    conv_ref  : (2, C0+1, C1)       per layer: rows 0..31 = 1x1 conv weight,
                                    row 32 = conv bias
    wsq_ref   : (2*C1, 2*C1)        block-diag(conv_w0**2, conv_w1**2) for the
                                    fused demodulation matmul (precomputed)
    rgb_ref   : (IMG_C+1, C1)       rows 0..2 = toRGB weight (transposed),
                                    row 3 = toRGB bias (padded to C1)
    out_ref   : (BT, IMG_C, HW)     clamped image, channels-first
    """
    eps = jnp.float32(1e-8)
    gain = jnp.float32(math.sqrt(2.0))
    neg_gain = jnp.float32(0.2 * math.sqrt(2.0))

    w = w_ref[...]                              # (BT, W_DIM)
    bt = w.shape[0]

    # ---- all three style affines fused into one (BT,32)@(32,96) matmul -----
    aff = aff_ref[...]                          # (33, 96)
    styles = (jnp.dot(w, aff[:W_DIM, :], preferred_element_type=jnp.float32)
              + aff[W_DIM, :])                  # (BT, 96)
    s0 = styles[:, 0:C1]
    s1 = styles[:, C1:2 * C1]
    srgb = styles[:, 2 * C1:3 * C1]

    # ---- both demodulation factors from one (BT,64)@(64,64) matmul ---------
    # d = rsqrt(sum_k (s_k * w_kj)^2 + eps) done on precomputed weight**2.
    s01 = styles[:, 0:2 * C1]
    d01 = jax.lax.rsqrt(
        jnp.dot(s01 * s01, wsq_ref[...], preferred_element_type=jnp.float32)
        + eps)                                  # (BT, 64)
    d0 = d01[:, 0:C1]
    d1 = d01[:, C1:2 * C1]

    def styled_conv(x, s, d, layer):
        # x: (HW, Cin) shared constant, or (BT, HW, Cin) per-sample features
        cw = conv_ref[layer]                    # (C0+1, C1)
        if x.ndim == 2:
            xs = x[None, :, :] * s[:, None, :]  # (BT, HW, Cin)
        else:
            xs = x * s[:, None, :]
        cin = xs.shape[-1]
        # fold batch into M: one (BT*HW, Cin) @ (Cin, C1) matmul on the MXU
        y = jnp.dot(xs.reshape(bt * HW, cin), cw[:cin, :],
                    preferred_element_type=jnp.float32)
        y = y.reshape(bt, HW, C1) * d[:, None, :] + cw[cin, :]
        # StyleGAN bias_act: leaky relu (0.2) with gain sqrt(2) folded in
        return y * jnp.where(y >= 0.0, gain, neg_gain)

    x = styled_conv(const_ref[...], s0, d0, 0)  # (BT, HW, C1)
    x = styled_conv(x, s1, d1, 1)               # (BT, HW, C1)

    # ---- toRGB: modulated, no demodulation, no activation ------------------
    # Channels-first output (BT, 3, HW): per channel a lane-axis reduction,
    # so no lane-padded image ever hits VMEM/HBM and no transpose is needed.
    rgb = rgb_ref[...]                          # (IMG_C+1, C1)
    for c in range(IMG_C):
        coef = srgb * rgb[c, :]                 # (BT, C1)
        out_c = (jnp.sum(x * coef[:, None, :], axis=-1)
                 + rgb[IMG_C:IMG_C + 1, c:c + 1])       # (BT, HW)
        out_ref[:, c:c + 1, :] = jnp.clip(out_c, -1.0, 1.0)[:, None, :]


def make_params(key):
    """Deterministic synthetic generator parameters, packed for the kernel.

    All per-call prep (weight**2, packing, transposes) is done here once.
    """
    ks = jax.random.split(key, 8)

    def nrm(k, shape, scale):
        return jax.random.normal(k, shape, jnp.float32) * scale

    # raw synthetic parameters
    const = nrm(ks[0], (HW, C0), 1.0)
    aff_w = nrm(ks[1], (3, W_DIM, C1), 1.0 / math.sqrt(W_DIM))
    aff_b = jnp.ones((3, C1), jnp.float32)          # StyleGAN: style bias ~ 1
    conv_w = jnp.stack([nrm(ks[2], (C0, C1), 1.0 / math.sqrt(C0)),
                        nrm(ks[3], (C1, C1), 1.0 / math.sqrt(C1))])
    conv_b = jnp.zeros((2, C1), jnp.float32)
    wrgb = nrm(ks[4], (C1, IMG_C), 1.0 / math.sqrt(C1))
    brgb = jnp.zeros((IMG_C,), jnp.float32)

    # ---- packed / precomputed kernel inputs (hoisted one-time prep) --------
    aff = jnp.concatenate(
        [jnp.concatenate([aff_w[0], aff_w[1], aff_w[2]], axis=1),   # (32, 96)
         jnp.concatenate([aff_b[0], aff_b[1], aff_b[2]])[None, :]], # (1, 96)
        axis=0)                                                     # (33, 96)

    conv = jnp.concatenate([conv_w, conv_b[:, None, :]], axis=1)    # (2, 33, 32)

    zero = jnp.zeros((C1, C1), jnp.float32)
    wsq = jnp.concatenate(
        [jnp.concatenate([conv_w[0] ** 2, zero], axis=1),
         jnp.concatenate([zero, conv_w[1] ** 2], axis=1)], axis=0)  # (64, 64)

    rgb = jnp.concatenate(
        [wrgb.T, jnp.pad(brgb, (0, C1 - IMG_C))[None, :]], axis=0)  # (4, 32)

    return {"const": const, "aff": aff, "conv": conv, "wsq": wsq, "rgb": rgb}


def stylegan_wrapper_forward(w, params):
    """Mirrors StyleGAN_Wrapper.forward: broadcast w to num_ws, synthesize, clamp.

    w: (B, W_DIM) float32  ->  image (B, 3, H, W) float32 in [-1, 1] (NCHW).

    Note: forward broadcasts a single w to all num_ws layers, so w is passed
    (B, W_DIM) directly -- the (B, NUM_WS, W_DIM) expand is never materialized.
    """
    B = w.shape[0]
    w = w.astype(jnp.float32)

    # Batch tiling: tiles are multiples of 8 and, whenever B > 8, the batch is
    # split into >= 2 "parallel" grid steps so both TensorCores run on v7x.
    if B <= 8:
        b_tile = B
        b_pad = B
    else:
        b_tile = min(MAX_B_TILE, _round_up(pl.cdiv(B, 2), 8))
        b_pad = _round_up(B, b_tile)
    if b_pad != B:
        w = jnp.pad(w, ((0, b_pad - B), (0, 0)))

    grid = (b_pad // b_tile,)

    def inv(shape):  # grid-invariant (shared) parameter block
        return pl.BlockSpec(shape, lambda i: tuple(0 for _ in shape))

    out = pl.pallas_call(
        _synthesis_kernel,
        out_shape=jax.ShapeDtypeStruct((b_pad, IMG_C, HW), jnp.float32),
        grid_spec=pltpu.PrefetchScalarGridSpec(
            num_scalar_prefetch=0,
            grid=grid,
            in_specs=[
                pl.BlockSpec((b_tile, W_DIM), lambda i: (i, 0)),   # latents
                inv((HW, C0)),                                     # const
                inv((W_DIM + 1, 3 * C1)),                          # fused affine
                inv((2, C0 + 1, C1)),                              # conv w + b
                inv((2 * C1, 2 * C1)),                             # demod w**2
                inv((IMG_C + 1, C1)),                              # toRGB w + b
            ],
            out_specs=pl.BlockSpec((b_tile, IMG_C, HW),
                                   lambda i: (i, 0, 0)),
        ),
        compiler_params=pltpu.CompilerParams(
            dimension_semantics=("parallel",),
            vmem_limit_bytes=VMEM_LIMIT),
    )(w, params["const"], params["aff"], params["conv"],
      params["wsq"], params["rgb"])

    # strip batch padding; (B, 3, H*W) -> NCHW (B, 3, H, W) is a pure reshape
    return out[:B].reshape(B, IMG_C, H, W)


if __name__ == "__main__":
    key = jax.random.PRNGKey(0)
    k_params, k_w = jax.random.split(key)
    params = make_params(k_params)

    B = 2
    w = jax.random.normal(k_w, (B, W_DIM), jnp.float32)

    img = stylegan_wrapper_forward(w, params)
    jax.block_until_ready(img)

    assert img.shape == (B, IMG_C, H, W), img.shape
    assert img.dtype == jnp.float32
    assert bool(jnp.all(img <= 1.0)) and bool(jnp.all(img >= -1.0))
    print("KERNEL_OK")
</pallas_src>

<mosaic_0001>
module attributes {stable_mosaic.version = 11 : i64} {
  func.func @_synthesis_kernel(%arg0: i32, %arg1: memref<2x32xf32, #tpu.memory_space<vmem>>, %arg2: memref<64x32xf32, #tpu.memory_space<vmem>>, %arg3: memref<33x96xf32, #tpu.memory_space<vmem>>, %arg4: memref<2x33x32xf32, #tpu.memory_space<vmem>>, %arg5: memref<64x64xf32, #tpu.memory_space<vmem>>, %arg6: memref<4x32xf32, #tpu.memory_space<vmem>>, %arg7: memref<2x3x64xf32, #tpu.memory_space<vmem>>) attributes {dimension_semantics = [#tpu.dimension_semantics<parallel>], iteration_bounds = array<i64: 1>, scalar_prefetch = 0 : i64, scratch_operands = 0 : i64, tpu.core_type = #tpu.core_type<tc>, window_params = [{transform_indices = @transform_0, window_bounds = array<i64: 2, 32>}, {pipeline_mode = #tpu.pipeline_mode<synchronous>, transform_indices = @transform_1, window_bounds = array<i64: 64, 32>}, {pipeline_mode = #tpu.pipeline_mode<synchronous>, transform_indices = @transform_2, window_bounds = array<i64: 33, 96>}, {pipeline_mode = #tpu.pipeline_mode<synchronous>, transform_indices = @transform_3, window_bounds = array<i64: 2, 33, 32>}, {pipeline_mode = #tpu.pipeline_mode<synchronous>, transform_indices = @transform_4, window_bounds = array<i64: 64, 64>}, {pipeline_mode = #tpu.pipeline_mode<synchronous>, transform_indices = @transform_5, window_bounds = array<i64: 4, 32>}, {transform_indices = @transform_6, window_bounds = array<i64: 2, 3, 64>}]} {
    %c0 = arith.constant 0 : index
    %c0_0 = arith.constant 0 : index
    %0 = vector.load %arg1[%c0, %c0_0] : memref<2x32xf32, #tpu.memory_space<vmem>>, vector<2x32xf32>
    %c0_1 = arith.constant 0 : index
    %c0_2 = arith.constant 0 : index
    %1 = vector.load %arg3[%c0_1, %c0_2] : memref<33x96xf32, #tpu.memory_space<vmem>>, vector<33x96xf32>
    %2 = vector.extract_strided_slice %1 {offsets = [0, 0], sizes = [32, 96], strides = [1, 1]} : vector<33x96xf32> to vector<32x96xf32>
    %cst = arith.constant dense<0.000000e+00> : vector<2x96xf32>
    %3 = tpu.matmul %0, %2, %cst {dimension_numbers = #tpu.dot_dimension_numbers<[1], [0], [0], [1], [0, 0, 1, 1], [], []>} : vector<2x32xf32>, vector<32x96xf32>, vector<2x96xf32> -> vector<2x96xf32>
    %4 = vector.extract_strided_slice %1 {offsets = [32, 0], sizes = [1, 96], strides = [1, 1]} : vector<33x96xf32> to vector<1x96xf32>
    %5 = vector.shape_cast %4 : vector<1x96xf32> to vector<96xf32>
    %6 = vector.shape_cast %5 : vector<96xf32> to vector<1x96xf32>
    %7 = vector.broadcast %6 : vector<1x96xf32> to vector<2x96xf32>
    %8 = arith.addf %3, %7 : vector<2x96xf32>
    %9 = vector.extract_strided_slice %8 {offsets = [0, 0], sizes = [2, 32], strides = [1, 1]} : vector<2x96xf32> to vector<2x32xf32>
    %10 = vector.extract_strided_slice %8 {offsets = [0, 32], sizes = [2, 32], strides = [1, 1]} : vector<2x96xf32> to vector<2x32xf32>
    %11 = vector.extract_strided_slice %8 {offsets = [0, 64], sizes = [2, 32], strides = [1, 1]} : vector<2x96xf32> to vector<2x32xf32>
    %12 = vector.extract_strided_slice %8 {offsets = [0, 0], sizes = [2, 64], strides = [1, 1]} : vector<2x96xf32> to vector<2x64xf32>
    %13 = arith.mulf %12, %12 : vector<2x64xf32>
    %c0_3 = arith.constant 0 : index
    %c0_4 = arith.constant 0 : index
    %14 = vector.load %arg5[%c0_3, %c0_4] : memref<64x64xf32, #tpu.memory_space<vmem>>, vector<64x64xf32>
    %cst_5 = arith.constant dense<0.000000e+00> : vector<2x64xf32>
    %15 = tpu.matmul %13, %14, %cst_5 {dimension_numbers = #tpu.dot_dimension_numbers<[1], [0], [0], [1], [0, 0, 1, 1], [], []>} : vector<2x64xf32>, vector<64x64xf32>, vector<2x64xf32> -> vector<2x64xf32>
    %cst_6 = arith.constant 9.99999993E-9 : f32
    %16 = vector.broadcast %cst_6 : f32 to vector<2x64xf32>
    %17 = arith.addf %15, %16 : vector<2x64xf32>
    %18 = math.rsqrt %17 : vector<2x64xf32>
    %19 = vector.extract_strided_slice %18 {offsets = [0, 0], sizes = [2, 32], strides = [1, 1]} : vector<2x64xf32> to vector<2x32xf32>
    %20 = vector.extract_strided_slice %18 {offsets = [0, 32], sizes = [2, 32], strides = [1, 1]} : vector<2x64xf32> to vector<2x32xf32>
    %c0_7 = arith.constant 0 : index
    %c0_8 = arith.constant 0 : index
    %21 = vector.load %arg2[%c0_7, %c0_8] : memref<64x32xf32, #tpu.memory_space<vmem>>, vector<64x32xf32>
    %c0_9 = arith.constant 0 : index
    %c0_10 = arith.constant 0 : index
    %c0_11 = arith.constant 0 : index
    %22 = vector.load %arg4[%c0_9, %c0_10, %c0_11] : memref<2x33x32xf32, #tpu.memory_space<vmem>>, vector<1x33x32xf32>
    %23 = vector.shape_cast %22 : vector<1x33x32xf32> to vector<33x32xf32>
    %24 = vector.shape_cast %21 : vector<64x32xf32> to vector<1x64x32xf32>
    %25 = vector.shape_cast %9 : vector<2x32xf32> to vector<2x1x32xf32>
    %26 = vector.broadcast %24 : vector<1x64x32xf32> to vector<2x64x32xf32>
    %27 = vector.broadcast %25 : vector<2x1x32xf32> to vector<2x64x32xf32>
    %28 = arith.mulf %26, %27 : vector<2x64x32xf32>
    %29 = vector.shape_cast %28 : vector<2x64x32xf32> to vector<128x32xf32>
    %30 = vector.extract_strided_slice %23 {offsets = [0, 0], sizes = [32, 32], strides = [1, 1]} : vector<33x32xf32> to vector<32x32xf32>
    %cst_12 = arith.constant dense<0.000000e+00> : vector<128x32xf32>
    %31 = tpu.matmul %29, %30, %cst_12 {dimension_numbers = #tpu.dot_dimension_numbers<[1], [0], [0], [1], [0, 0, 1, 1], [], []>} : vector<128x32xf32>, vector<32x32xf32>, vector<128x32xf32> -> vector<128x32xf32>
    %32 = vector.shape_cast %31 : vector<128x32xf32> to vector<2x64x32xf32>
    %33 = vector.shape_cast %19 : vector<2x32xf32> to vector<2x1x32xf32>
    %34 = vector.broadcast %33 : vector<2x1x32xf32> to vector<2x64x32xf32>
    %35 = arith.mulf %32, %34 : vector<2x64x32xf32>
    %36 = vector.extract_strided_slice %23 {offsets = [32, 0], sizes = [1, 32], strides = [1, 1]} : vector<33x32xf32> to vector<1x32xf32>
    %37 = vector.shape_cast %36 : vector<1x32xf32> to vector<32xf32>
    %38 = vector.shape_cast %37 : vector<32xf32> to vector<1x1x32xf32>
    %39 = vector.broadcast %38 : vector<1x1x32xf32> to vector<2x64x32xf32>
    %40 = arith.addf %35, %39 : vector<2x64x32xf32>
    %cst_13 = arith.constant 0.000000e+00 : f32
    %41 = vector.broadcast %cst_13 : f32 to vector<2x64x32xf32>
    %42 = arith.cmpf oge, %40, %41 : vector<2x64x32xf32>
    %cst_14 = arith.constant 1.41421354 : f32
    %cst_15 = arith.constant 0.282842726 : f32
    %43 = vector.broadcast %cst_14 : f32 to vector<2x64x32xf32>
    %44 = vector.broadcast %cst_15 : f32 to vector<2x64x32xf32>
    %45 = arith.select %42, %43, %44 : vector<2x64x32xi1>, vector<2x64x32xf32>
    %46 = arith.mulf %40, %45 : vector<2x64x32xf32>
    %c1 = arith.constant 1 : index
    %c0_16 = arith.constant 0 : index
    %c0_17 = arith.constant 0 : index
    %47 = vector.load %arg4[%c1, %c0_16, %c0_17] : memref<2x33x32xf32, #tpu.memory_space<vmem>>, vector<1x33x32xf32>
    %48 = vector.shape_cast %47 : vector<1x33x32xf32> to vector<33x32xf32>
    %49 = vector.shape_cast %10 : vector<2x32xf32> to vector<2x1x32xf32>
    %50 = vector.broadcast %49 : vector<2x1x32xf32> to vector<2x64x32xf32>
    %51 = arith.mulf %46, %50 : vector<2x64x32xf32>
    %52 = vector.shape_cast %51 : vector<2x64x32xf32> to vector<128x32xf32>
    %53 = vector.extract_strided_slice %48 {offsets = [0, 0], sizes = [32, 32], strides = [1, 1]} : vector<33x32xf32> to vector<32x32xf32>
    %cst_18 = arith.constant dense<0.000000e+00> : vector<128x32xf32>
    %54 = tpu.matmul %52, %53, %cst_18 {dimension_numbers = #tpu.dot_dimension_numbers<[1], [0], [0], [1], [0, 0, 1, 1], [], []>} : vector<128x32xf32>, vector<32x32xf32>, vector<128x32xf32> -> vector<128x32xf32>
    %55 = vector.shape_cast %54 : vector<128x32xf32> to vector<2x64x32xf32>
    %56 = vector.shape_cast %20 : vector<2x32xf32> to vector<2x1x32xf32>
    %57 = vector.broadcast %56 : vector<2x1x32xf32> to vector<2x64x32xf32>
    %58 = arith.mulf %55, %57 : vector<2x64x32xf32>
    %59 = vector.extract_strided_slice %48 {offsets = [32, 0], sizes = [1, 32], strides = [1, 1]} : vector<33x32xf32> to vector<1x32xf32>
    %60 = vector.shape_cast %59 : vector<1x32xf32> to vector<32xf32>
    %61 = vector.shape_cast %60 : vector<32xf32> to vector<1x1x32xf32>
    %62 = vector.broadcast %61 : vector<1x1x32xf32> to vector<2x64x32xf32>
    %63 = arith.addf %58, %62 : vector<2x64x32xf32>
    %cst_19 = arith.constant 0.000000e+00 : f32
    %64 = vector.broadcast %cst_19 : f32 to vector<2x64x32xf32>
    %65 = arith.cmpf oge, %63, %64 : vector<2x64x32xf32>
    %cst_20 = arith.constant 1.41421354 : f32
    %cst_21 = arith.constant 0.282842726 : f32
    %66 = vector.broadcast %cst_20 : f32 to vector<2x64x32xf32>
    %67 = vector.broadcast %cst_21 : f32 to vector<2x64x32xf32>
    %68 = arith.select %65, %66, %67 : vector<2x64x32xi1>, vector<2x64x32xf32>
    %69 = arith.mulf %63, %68 : vector<2x64x32xf32>
    %c0_22 = arith.constant 0 : index
    %c0_23 = arith.constant 0 : index
    %70 = vector.load %arg6[%c0_22, %c0_23] : memref<4x32xf32, #tpu.memory_space<vmem>>, vector<4x32xf32>
    %71 = vector.extract_strided_slice %70 {offsets = [0, 0], sizes = [1, 32], strides = [1, 1]} : vector<4x32xf32> to vector<1x32xf32>
    %72 = vector.shape_cast %71 : vector<1x32xf32> to vector<32xf32>
    %73 = vector.shape_cast %72 : vector<32xf32> to vector<1x32xf32>
    %74 = vector.broadcast %73 : vector<1x32xf32> to vector<2x32xf32>
    %75 = arith.mulf %11, %74 : vector<2x32xf32>
    %76 = vector.shape_cast %75 : vector<2x32xf32> to vector<2x1x32xf32>
    %77 = vector.broadcast %76 : vector<2x1x32xf32> to vector<2x64x32xf32>
    %78 = arith.mulf %69, %77 : vector<2x64x32xf32>
    %cst_24 = arith.constant dense<0.000000e+00> : vector<2x64xf32>
    %79 = vector.multi_reduction <add>, %78, %cst_24 [2] : vector<2x64x32xf32> to vector<2x64xf32>
    %80 = vector.extract_strided_slice %70 {offsets = [3, 0], sizes = [1, 1], strides = [1, 1]} : vector<4x32xf32> to vector<1x1xf32>
    %81 = vector.broadcast %80 : vector<1x1xf32> to vector<2x64xf32>
    %82 = arith.addf %79, %81 : vector<2x64xf32>
    %cst_25 = arith.constant -1.000000e+00 : f32
    %cst_26 = arith.constant 1.000000e+00 : f32
    %83 = vector.broadcast %cst_25 : f32 to vector<2x64xf32>
    %84 = arith.maximumf %83, %82 : vector<2x64xf32>
    %85 = vector.broadcast %cst_26 : f32 to vector<2x64xf32>
    %86 = arith.minimumf %85, %84 : vector<2x64xf32>
    %87 = vector.shape_cast %86 : vector<2x64xf32> to vector<2x1x64xf32>
    %c0_27 = arith.constant 0 : index
    %c0_28 = arith.constant 0 : index
    %c0_29 = arith.constant 0 : index
    %88 = vector.load %arg7[%c0_27, %c0_28, %c0_29] : memref<2x3x64xf32, #tpu.memory_space<vmem>>, vector<2x1x64xf32>
    tpu.vector_store %arg7[%c0_27, %c0_28, %c0_29], %87 {strides = array<i32>} : memref<2x3x64xf32, #tpu.memory_space<vmem>>, vector<2x1x64xf32>,
    %89 = vector.extract_strided_slice %70 {offsets = [1, 0], sizes = [1, 32], strides = [1, 1]} : vector<4x32xf32> to vector<1x32xf32>
    %90 = vector.shape_cast %89 : vector<1x32xf32> to vector<32xf32>
    %91 = vector.shape_cast %90 : vector<32xf32> to vector<1x32xf32>
    %92 = vector.broadcast %91 : vector<1x32xf32> to vector<2x32xf32>
    %93 = arith.mulf %11, %92 : vector<2x32xf32>
    %94 = vector.shape_cast %93 : vector<2x32xf32> to vector<2x1x32xf32>
    %95 = vector.broadcast %94 : vector<2x1x32xf32> to vector<2x64x32xf32>
    %96 = arith.mulf %69, %95 : vector<2x64x32xf32>
    %cst_30 = arith.constant dense<0.000000e+00> : vector<2x64xf32>
    %97 = vector.multi_reduction <add>, %96, %cst_30 [2] : vector<2x64x32xf32> to vector<2x64xf32>
    %98 = vector.extract_strided_slice %70 {offsets = [3, 1], sizes = [1, 1], strides = [1, 1]} : vector<4x32xf32> to vector<1x1xf32>
    %99 = vector.broadcast %98 : vector<1x1xf32> to vector<2x64xf32>
    %100 = arith.addf %97, %99 : vector<2x64xf32>
    %cst_31 = arith.constant -1.000000e+00 : f32
    %cst_32 = arith.constant 1.000000e+00 : f32
    %101 = vector.broadcast %cst_31 : f32 to vector<2x64xf32>
    %102 = arith.maximumf %101, %100 : vector<2x64xf32>
    %103 = vector.broadcast %cst_32 : f32 to vector<2x64xf32>
    %104 = arith.minimumf %103, %102 : vector<2x64xf32>
    %105 = vector.shape_cast %104 : vector<2x64xf32> to vector<2x1x64xf32>
    %c0_33 = arith.constant 0 : index
    %c1_34 = arith.constant 1 : index
    %c0_35 = arith.constant 0 : index
    %106 = vector.load %arg7[%c0_33, %c1_34, %c0_35] : memref<2x3x64xf32, #tpu.memory_space<vmem>>, vector<2x1x64xf32>
    tpu.vector_store %arg7[%c0_33, %c1_34, %c0_35], %105 {strides = array<i32>} : memref<2x3x64xf32, #tpu.memory_space<vmem>>, vector<2x1x64xf32>,
    %107 = vector.extract_strided_slice %70 {offsets = [2, 0], sizes = [1, 32], strides = [1, 1]} : vector<4x32xf32> to vector<1x32xf32>
    %108 = vector.shape_cast %107 : vector<1x32xf32> to vector<32xf32>
    %109 = vector.shape_cast %108 : vector<32xf32> to vector<1x32xf32>
    %110 = vector.broadcast %109 : vector<1x32xf32> to vector<2x32xf32>
    %111 = arith.mulf %11, %110 : vector<2x32xf32>
    %112 = vector.shape_cast %111 : vector<2x32xf32> to vector<2x1x32xf32>
    %113 = vector.broadcast %112 : vector<2x1x32xf32> to vector<2x64x32xf32>
    %114 = arith.mulf %69, %113 : vector<2x64x32xf32>
    %cst_36 = arith.constant dense<0.000000e+00> : vector<2x64xf32>
    %115 = vector.multi_reduction <add>, %114, %cst_36 [2] : vector<2x64x32xf32> to vector<2x64xf32>
    %116 = vector.extract_strided_slice %70 {offsets = [3, 2], sizes = [1, 1], strides = [1, 1]} : vector<4x32xf32> to vector<1x1xf32>
    %117 = vector.broadcast %116 : vector<1x1xf32> to vector<2x64xf32>
    %118 = arith.addf %115, %117 : vector<2x64xf32>
    %cst_37 = arith.constant -1.000000e+00 : f32
    %cst_38 = arith.constant 1.000000e+00 : f32
    %119 = vector.broadcast %cst_37 : f32 to vector<2x64xf32>
    %120 = arith.maximumf %119, %118 : vector<2x64xf32>
    %121 = vector.broadcast %cst_38 : f32 to vector<2x64xf32>
    %122 = arith.minimumf %121, %120 : vector<2x64xf32>
    %123 = vector.shape_cast %122 : vector<2x64xf32> to vector<2x1x64xf32>
    %c0_39 = arith.constant 0 : index
    %c2 = arith.constant 2 : index
    %c0_40 = arith.constant 0 : index
    %124 = vector.load %arg7[%c0_39, %c2, %c0_40] : memref<2x3x64xf32, #tpu.memory_space<vmem>>, vector<2x1x64xf32>
    tpu.vector_store %arg7[%c0_39, %c2, %c0_40], %123 {strides = array<i32>} : memref<2x3x64xf32, #tpu.memory_space<vmem>>, vector<2x1x64xf32>,
    return
  }
  func.func @transform_0(%arg0: i32) -> (i32, i32) {
    %c0_i32 = arith.constant 0 : i32
    %c0_i32_0 = arith.constant 0 : i32
    return %arg0, %c0_i32 : i32, i32
  }
  func.func @transform_1(%arg0: i32) -> (i32, i32) {
    %c0_i32 = arith.constant 0 : i32
    %c0_i32_0 = arith.constant 0 : i32
    %c0_i32_1 = arith.constant 0 : i32
    return %c0_i32, %c0_i32_0 : i32, i32
  }
  func.func @transform_2(%arg0: i32) -> (i32, i32) {
    %c0_i32 = arith.constant 0 : i32
    %c0_i32_0 = arith.constant 0 : i32
    %c0_i32_1 = arith.constant 0 : i32
    return %c0_i32, %c0_i32_0 : i32, i32
  }
  func.func @transform_3(%arg0: i32) -> (i32, i32, i32) {
    %c0_i32 = arith.constant 0 : i32
    %c0_i32_0 = arith.constant 0 : i32
    %c0_i32_1 = arith.constant 0 : i32
    %c0_i32_2 = arith.constant 0 : i32
    return %c0_i32, %c0_i32_0, %c0_i32_1 : i32, i32, i32
  }
  func.func @transform_4(%arg0: i32) -> (i32, i32) {
    %c0_i32 = arith.constant 0 : i32
    %c0_i32_0 = arith.constant 0 : i32
    %c0_i32_1 = arith.constant 0 : i32
    return %c0_i32, %c0_i32_0 : i32, i32
  }
  func.func @transform_5(%arg0: i32) -> (i32, i32) {
    %c0_i32 = arith.constant 0 : i32
    %c0_i32_0 = arith.constant 0 : i32
    %c0_i32_1 = arith.constant 0 : i32
    return %c0_i32, %c0_i32_0 : i32, i32
  }
  func.func @transform_6(%arg0: i32) -> (i32, i32, i32) {
    %c0_i32 = arith.constant 0 : i32
    %c0_i32_0 = arith.constant 0 : i32
    %c0_i32_1 = arith.constant 0 : i32
    return %arg0, %c0_i32, %c0_i32_0 : i32, i32, i32
  }
}

</mosaic_0001>

<bundles_post_ra>
// kernel: tpu_custom_call.1
= control target key start
LH: loop header
LB: loop body
LE: loop exit
PB: predicated region body
PF: predicated region fallthrough
CT: control target
= control target key end

     0   :  { %v1972_v0 = vmov 0.0|0.0   ;;  %vm1973_vm0 = vmmov 0   ;;  %v1974_v4 = vmov 0.0   ;;  %v208_v5 = vlaneseq  ;;  %s1975_s20 = smov 64   ;;  %s1976_s28 = smov 127   ;;  %s2705_s2 = inlined_call_operand.vmem [shape: f32[33,96], index: 2, kind: input, shape index: {}]   ;;  %s2706_s4 = inlined_call_operand.vmem [shape: f32[64,64], index: 4, kind: input, shape index: {}]   ;;  %s2707_s5 = inlined_call_operand.vmem [shape: f32[4,32], index: 5, kind: input, shape index: {}]   ;;  %s2708_s0 = inlined_call_operand.vmem [shape: f32[2,32], index: 0, kind: input, shape index: {}]   ;;  %s2709_s3 = inlined_call_operand.vmem [shape: f32[2,33,32], index: 3, kind: input, shape index: {}]   ;;  %s2710_s1 = inlined_call_operand.vmem [shape: f32[64,32], index: 1, kind: input, shape index: {}]   ;;  %s2711_s6 = inlined_call_operand.vmem [shape: f32[2,3,64], index: 6, kind: output, shape index: {}]  }
   0x1   :  { %1917 = vmatprep.subr.bf16.mxu0 %v1972_v0  ;;  %v24_v1 = vld [vmem:[%s2705_s2] sm:$0xff]  ;;  %v25_v2 = vld [vmem:[%s2705_s2 + $0x8] sm:$0xff]  ;;  %v26_v3 = vld [vmem:[%s2705_s2 + $0x10] sm:$0xff]  ;;  %1831 = vmatprep.mubr.msk.f32.mxu0 %vm1973_vm0, %v1974_v4  ;;  %vm33_vm1 = vcmask 261120   ;;  %s1977_s8 = smov 126   ;;  %vm116_vm2 = vcmask 523264  }
   0x2   :  { %v1918_v6 = vpack.c.bf16 %v25_v2, %v24_v1  ;;  %v27_v7 = vld [vmem:[%s2705_s2 + $0x18] sm:$0xff]  ;;  %1923 = vmatprep.subr.bf16.mxu1 %v1972_v0  ;;  %1850 = vmatprep.mubr.msk.f32.mxu1 %vm1973_vm0, %v1974_v4  ;;  %v2029_v8 = vshrl.u32 %v208_v5, 7  ;;  %v108_v9 = vld [vmem:[%s2706_s4] sm:$0xff]  ;;  %v109_v10 = vld [vmem:[%s2706_s4 + $0x8] sm:$0xff]  ;;  %v1978_v38 = vmov 1966171168  }
   0x3   :  { %v110_v11 = vld [vmem:[%s2706_s4 + $0x10] sm:$0xff]  ;;  %v1921_v12 = vpack.c.bf16 %v27_v7, %v26_v3  ;;  %v2043_v13 = vld [vmem:[%s2707_s5] sm:$0xf]  ;;  %v1924_v14 = vpack.c.bf16 %v109_v10, %v108_v9  ;;  %v111_v15 = vld [vmem:[%s2706_s4 + $0x18] sm:$0xff]  ;;  %v206_v39 = vunpack.c.l.s4 %v1978_v38  ;;  %s1979_s5 = smov 96  }
   0x4   :  { %1919 = vmatpush3.bf16.msra.mxu0 %v1918_v6  ;;  %v2049_v16 = vsub.s32 0, %v2029_v8  ;;  %v1155_v17 = vsub.s32 1, %v2029_v8  ;;  %v1927_v18 = vpack.c.bf16 %v111_v15, %v110_v11  ;;  %v112_v20 = vld [vmem:[%s2706_s4 + $0x20] sm:$0xff]  ;;  %v113_v21 = vld [vmem:[%s2706_s4 + $0x28] sm:$0xff]  ;;  %v114_v25 = vld [vmem:[%s2706_s4 + $0x30] sm:$0xff]  ;;  %v986_v28 = vrot.slane %v2043_v13, 3 }
   0x5   :  { %1920 = vmatprep.subr.bf16.mxu0 %v1972_v0  ;;  %1925 = vmatpush3.bf16.msra.mxu1 %v1924_v14  ;;  %v23_v22 = vld [vmem:[%s2708_s0] sm:$0x3]  ;;  %v1930_v24 = vpack.c.bf16 %v113_v21, %v112_v20  ;;  %v115_v26 = vld [vmem:[%s2706_s4 + $0x38] sm:$0xff]  ;;  %v200_v30 = vld [vmem:[%s2709_s3 + $0x8] sm:$0xff]  ;;  %v207_v41 = vunpack.c.0.s8 %v206_v39  ;;  %v1416_v63 = vsub.s32 2, %v2029_v8 }
   0x6   :  { %v878_v19 = vrot.slane %v2043_v13, %v2049_v16  ;;  %1926 = vmatprep.subr.bf16.mxu1 %v1972_v0  ;;  %v1156_v23 = vrot.slane %v2043_v13, %v1155_v17  ;;  %v1933_v27 = vpack.c.bf16 %v115_v26, %v114_v25  ;;  %v199_v29 = vld [vmem:[%s2709_s3] sm:$0xff]  ;;  %1955 = vpush %v986_v28  ;;  %v201_v32 = vld [vmem:[%s2709_s3 + $0x10] sm:$0xff]  ;;  %v202_v33 = vld [vmem:[%s2709_s3 + $0x18] sm:$0xff] }
   0x7   :  { %v1935_v31 = vpack.c.bf16 %v200_v30, %v199_v29  ;;  %v1939_v34 = vpack.c.bf16 %v202_v33, %v201_v32  ;;  %v1679_v42 = vld [vmem:[%s2705_s2 + $0x20] ss:$0 sm:$0xff]  ;;  %v2090_v43 = vsub.s32 %v207_v41, %v2029_v8  ;;  %v192_v56 = vld [vmem:[%s2710_s1 + $0x8] sm:$0xff]  ;;  %v193_v60 = vld [vmem:[%s2710_s1 + $0x10] sm:$0xff]  ;;  %v1417_v9 = vrot.slane %v2043_v13, %v1416_v63 }
   0x8   :  { %1922 = vmatpush3.bf16.msra.mxu0 %v1921_v12  ;;  %880 = vrot.lane.b32.xlu1 %v878_v19, %s1975_s20  ;;  %v191_v55 = vld [vmem:[%s2710_s1] sm:$0xff]  ;;  %v194_v4 = vld [vmem:[%s2710_s1 + $0x18] sm:$0xff]  ;;  %v196_v15 = vld [vmem:[%s2710_s1 + $0x28] sm:$0xff] }
   0x9   :  { %1928 = vmatpush3.bf16.msra.mxu1 %v1927_v18  ;;  %1936 = vmatprep.subr.bf16.mxu0 %v1935_v31  ;;  %v195_v7 = vld [vmem:[%s2710_s1 + $0x20] sm:$0xff]  ;;  %v197_v18 = vld [vmem:[%s2710_s1 + $0x30] sm:$0xff]  ;;  %v1699_v13 = vld [vmem:[%s2709_s3 + $0x28] sm:$0xff] }
   0xa   :  { %1929 = vmatprep.subr.bf16.mxu1 %v1972_v0  ;;  %v1700_v19 = vld [vmem:[%s2709_s3 + $0x30] sm:$0xff] }
   0xb   :  { %1832 = vmatmul.mubr.msk.f32.vlgmr.msra.gmra.mrb[0].mxu0 %vm33_vm1, %v23_v22  ;;  %v1943_v20 = vpack.c.bf16 %v1700_v19, %v1699_v13 }
   0xc   :  { %1158 = vrot.lane.b32.xlu1 %v1156_v23, %s1975_s20  ;;  %1938 = vmatpush3.bf16.msra.mxu0 %v1935_v31 }
   0xd   :  { %1931 = vmatpush3.bf16.msra.mxu1 %v1930_v24  ;;  %1940 = vmatprep.subr.bf16.mxu0 %v1939_v34  ;;  %v198_v24 = vld [vmem:[%s2710_s1 + $0x38] sm:$0xff] }
   0xe   :  { %1932 = vmatprep.subr.bf16.mxu1 %v1972_v0 }
  0x10   :  { %1263 = vrot.lane.b32.xlu1 %v986_v28, %s1976_s28  ;;  %1942 = vmatpush3.bf16.msra.mxu0 %v1939_v34 }
  0x11   :  { %1934 = vmatpush3.bf16.msra.mxu1 %v1933_v27  ;;  %1944 = vmatprep.subr.bf16.mxu0 %v1943_v20 }
  0x12   :  { %1951 = vmatprep.subr.bf16.mxu1 %v1943_v20 }
  0x14   :  { %1524 = vrot.lane.b32.xlu1 %v986_v28, %s1977_s8 }
  0x7a   :  { %v881_v35 = vpop.permute.xlu1 %880 }
  0x7e   :  { %v1159_v36 = vpop.permute.xlu1 %1158 }
  0x82   :  { %v1264_v37 = vpop.permute.xlu1 %1263 }
  0x83   :  { %1957 = vpush %v1264_v37  ;;  %v1702_v37 = vld [vmem:[%s2709_s3 + $0x40] sm:$0xff] }
  0x86   :  { %v1525_v40 = vpop.permute.xlu1 %1524 }
  0x87   :  { %1959 = vpush %v1525_v40 }
  0xde   :  { %v103_v44 = vpop.f32.mrb[0].mxu0 }
  0xdf   :  { %v2092_v45 = vadd.f32 %v1679_v42, %v103_v44  ;;  %v1833_v46 = vpop.f32.mrb[1].mxu0 }
  0xe1   :  { %v211_v47 = vrot.slane %v2092_v45, %v2090_v43  ;;  %v1161_v48 = vmul.f32 %v1159_v36, %v2092_v45  ;;  %v107_v49 = vmul.f32 %v2092_v45, %v2092_v45  ;;  %v883_v50 = vmul.f32 %v881_v35, %v2092_v45  ;;  %v1701_v36 = vld [vmem:[%s2709_s3 + $0x38] sm:$0xff] }
  0xe2   :  { %v1947_v38 = vpack.c.bf16 %v1702_v37, %v1701_v36 }
  0xe3   :  { %v212_v51 = vcombine.high %v211_v47, %v211_v47  ;;  %v219_v52 = vrot.slane %v211_v47, %v2090_v43  ;;  %1851 = vmatmul.mubr.msk.f32.vlgmr.msra.gmra.mrb[0].mxu1 %vm116_vm2, %v107_v49  ;;  %v891_v53 = vrot.slane %v883_v50, %v2090_v43  ;;  %v1169_v54 = vrot.slane %v1161_v48, %v2090_v43 }
  0xe4   :  { %1953 = vmatpush3.bf16.msra.mxu1 %v1943_v20 }
  0xe5   :  { %v226_v57 = vrot.slane %v212_v51, %v2090_v43  ;;  %v230_v58 = vrot.slane %v219_v52, %v2049_v16  ;;  %v899_v59 = vrot.slane %v891_v53, %v2090_v43  ;;  %v1177_v0 = vrot.slane %v1169_v54, %v2090_v43  ;;  %1952 = vmatprep.subr.bf16.mxu1 %v1947_v38 }
  0xe6   :  { %v892_v6 = vcombine.high %v891_v53, %v891_v53  ;;  %v1170_v12 = vcombine.high %v1169_v54, %v1169_v54 }
  0xe7   :  { %569 = vrot.lane.b32.xlu0 %v230_v58, %s1979_s5  ;;  %v237_v61 = vmul.f32 %v230_v58, %v191_v55  ;;  %v238_v62 = vmul.f32 %v230_v58, %v192_v56  ;;  %v910_v1 = vrot.slane %v899_v59, %v2049_v16  ;;  %v234_v2 = vrot.slane %v226_v57, %v2049_v16 }
  0xe8   :  { %v239_v3 = vmul.f32 %v230_v58, %v193_v60  ;;  %v1188_v10 = vrot.slane %v1177_v0, %v2049_v16  ;;  %v240_v11 = vmul.f32 %v230_v58, %v194_v4  ;;  %v241_v14 = vmul.f32 %v230_v58, %v195_v7  ;;  %1954 = vmatpush3.bf16.msra.mxu1 %v1947_v38 }
  0xe9   :  { %1861 = vmatprep.mubr.msk.f32.mxu0 %vm33_vm1, %v237_v61  ;;  %915 = vrot.lane.b32.xlu1 %v910_v1, %s1975_s20  ;;  %v906_v17 = vrot.slane %v892_v6, %v2090_v43  ;;  %v242_v21 = vmul.f32 %v230_v58, %v196_v15  ;;  %v243_v22 = vmul.f32 %v230_v58, %v197_v18  ;;  %v2194_v1 = vld [vmem:[%s2709_s3 + $0x20] ss:$0 sm:$0xff] }
  0xea   :  { %1862 = vmatmul.mubr.msk.f32.vlgmr.msra.gmra.mrb[2].mxu0 %vm33_vm1, %v238_v62  ;;  %v1184_v25 = vrot.slane %v1170_v12, %v2090_v43  ;;  %v244_v26 = vmul.f32 %v230_v58, %v198_v24  ;;  %v245_v28 = vmul.f32 %v234_v2, %v191_v55  ;;  %v246_v29 = vmul.f32 %v234_v2, %v192_v56 }
  0xeb   :  { %1864 = vmatprep.mubr.msk.f32.mxu0 %vm33_vm1, %v239_v3  ;;  %571 = vrot.lane.b32.xlu0 %v234_v2, %s1979_s5  ;;  %v914_v23 = vrot.slane %v906_v17, %v2049_v16  ;;  %v247_v30 = vmul.f32 %v234_v2, %v193_v60  ;;  %v248_v31 = vmul.f32 %v234_v2, %v194_v4 }
  0xec   :  { %1946 = vmatpush3.bf16.msra.mxu0 %v1943_v20  ;;  %v1192_v27 = vrot.slane %v1184_v25, %v2049_v16  ;;  %v249_v32 = vmul.f32 %v234_v2, %v195_v7  ;;  %v250_v33 = vmul.f32 %v234_v2, %v196_v15  ;;  %v251_v34 = vmul.f32 %v234_v2, %v197_v18 }
  0xed   :  { %1193 = vrot.lane.b32.xlu1 %v1188_v10, %s1975_s20  ;;  %v252_v35 = vmul.f32 %v234_v2, %v198_v24  ;;  %1948 = vmatprep.subr.bf16.mxu0 %v1947_v38 }
  0xee   :  { %1865 = vmatmul.mubr.msk.f32.gmra.mrb[4].mxu0 %vm33_vm1, %v240_v11 }
  0xef   :  { %1867 = vmatprep.mubr.msk.f32.mxu0 %vm33_vm1, %v241_v14  ;;  %1419 = vrot.lane.b32.xlu0 %v1417_v9, %s1975_s20 }
  0xf0   :  { %1950 = vmatpush3.bf16.msra.mxu0 %v1947_v38 }
  0xf2   :  { %1868 = vmatmul.mubr.msk.f32.gmra.mrb[6].mxu0 %vm33_vm1, %v242_v21 }
  0xf3   :  { %1870 = vmatprep.mubr.msk.f32.mxu0 %vm33_vm1, %v243_v22  ;;  %917 = vrot.lane.b32.xlu0 %v914_v23, %s1975_s20  ;;  %v1980_v23 = vmov 0.28284273  }
  0xf6   :  { %1871 = vmatmul.mubr.msk.f32.gmra.mrb[8].mxu0 %vm33_vm1, %v244_v26 }
  0xf7   :  { %1195 = vrot.lane.b32.xlu0 %v1192_v27, %s1975_s20  ;;  %1873 = vmatprep.mubr.msk.f32.mxu0 %vm33_vm1, %v245_v28 }
  0xfa   :  { %1874 = vmatmul.mubr.msk.f32.gmra.mrb[10].mxu0 %vm33_vm1, %v246_v29 }
  0xfb   :  { %1876 = vmatprep.mubr.msk.f32.mxu0 %vm33_vm1, %v247_v30 }
  0xfe   :  { %1877 = vmatmul.mubr.msk.f32.gmra.mrb[12].mxu0 %vm33_vm1, %v248_v31 }
  0xff   :  { %1879 = vmatprep.mubr.msk.f32.mxu0 %vm33_vm1, %v249_v32 }
 0x102   :  { %1880 = vmatmul.mubr.msk.f32.gmra.mrb[14].mxu0 %vm33_vm1, %v250_v33 }
 0x103   :  { %1882 = vmatprep.mubr.msk.f32.mxu0 %vm33_vm1, %v251_v34 }
 0x106   :  { %1883 = vmatmul.mubr.msk.f32.gmra.mrb[16].mxu0 %vm33_vm1, %v252_v35 }
 0x159   :  { %v2175_v39 = vpop.permute.xlu0 %569 }
 0x15d   :  { %v2177_v40 = vpop.permute.xlu0 %571 }
 0x161   :  { %v1420_v41 = vpop.permute.xlu0 %1419 }
 0x162   :  { %v1422_v42 = vmul.f32 %v1420_v41, %v2092_v45 }
 0x164   :  { %v1430_v44 = vrot.slane %v1422_v42, %v2090_v43 }
 0x166   :  { %v1431_v46 = vcombine.high %v1430_v44, %v1430_v44  ;;  %v1438_v47 = vrot.slane %v1430_v44, %v2090_v43 }
 0x168   :  { %v1449_v48 = vrot.slane %v1438_v47, %v2049_v16  ;;  %v1445_v49 = vrot.slane %v1431_v46, %v2090_v43 }
 0x16a   :  { %1454 = vrot.lane.b32.xlu1 %v1449_v48, %s1975_s20  ;;  %v1453_v50 = vrot.slane %v1445_v49, %v2049_v16 }
 0x16e   :  { %1456 = vrot.lane.b32.xlu1 %v1453_v50, %s1975_s20 }
 0x1b6   :  { %v186_v51 = vpop.f32.mrb[0].mxu1 }
 0x1b7   :  { %v187_v52 = vadd.f32 1e-08, %v186_v51  ;;  %v1852_v53 = vpop.f32.mrb[1].mxu1 }
 0x1b9   :  { %1970 = vrsqrt.f32 %v187_v52 }
 0x1bd   :  { %v1863_v45 = vpop.f32.mrb[2].mxu0 }
 0x1be   :  { %v367_v54 = vpop.f32.mrb[3].mxu0 }
 0x1c1   :  { %v1866_v55 = vpop.f32.mrb[4].mxu0 }
 0x1c2   :  { %v377_v56 = vpop.f32.mrb[5].mxu0 }
 0x1c3   :  { %v1971_v57 = vpop.eup %1970 }
 0x1c4   :  { %v453_v58 = vrot.slane %v1971_v57, %v2090_v43 }
 0x1c5   :  { %v1869_v59 = vpop.f32.mrb[6].mxu0 }
 0x1c6   :  { %v454_v60 = vcombine.high %v453_v58, %v453_v58  ;;  %v461_v61 = vrot.slane %v453_v58, %v2090_v43  ;;  %v387_v62 = vpop.f32.mrb[7].mxu0 }
 0x1c8   :  { %v468_v63 = vrot.slane %v454_v60, %v2090_v43  ;;  %v472_v0 = vrot.slane %v461_v61, %v2049_v16 }
 0x1c9   :  { %v1872_v2 = vpop.f32.mrb[8].mxu0 }
 0x1ca   :  { %v2197_v3 = vrot.slane %v468_v63, %v2049_v16  ;;  %v480_v4 = vmul.f32 %v1863_v45, %v472_v0  ;;  %v479_v6 = vmul.f32 %v472_v0, %v367_v54  ;;  %v482_v7 = vmul.f32 %v1866_v55, %v472_v0  ;;  %784 = vrot.lane.b32.xlu1 %v472_v0, %s1979_s5  ;;  %v397_v9 = vpop.f32.mrb[9].mxu0 }
 0x1cb   :  { %v481_v10 = vmul.f32 %v472_v0, %v377_v56  ;;  %v484_v11 = vmul.f32 %v1869_v59, %v472_v0  ;;  %v483_v43 = vmul.f32 %v472_v0, %v387_v62  ;;  %v486_v12 = vmul.f32 %v1872_v2, %v472_v0 }
 0x1cc   :  { %v500_v14 = vadd.f32 %v2194_v1, %v480_v4  ;;  %v499_v15 = vadd.f32 %v2194_v1, %v479_v6  ;;  %v502_v17 = vadd.f32 %v2194_v1, %v482_v7  ;;  %v485_v18 = vmul.f32 %v472_v0, %v397_v9  ;;  %786 = vrot.lane.b32.xlu0 %v2197_v3, %s1979_s5 }
 0x1cd   :  { %v501_v16 = vadd.f32 %v2194_v1, %v481_v10  ;;  %v504_v13 = vadd.f32 %v2194_v1, %v484_v11  ;;  %v503_v19 = vadd.f32 %v2194_v1, %v483_v43  ;;  %v1875_v20 = vpop.f32.mrb[10].mxu0  ;;  %v506_v21 = vadd.f32 %v2194_v1, %v486_v12 }
 0x1ce   :  { %vm516_vm3 = vcmp.ge.f32.partialorder %v500_v14, 0.0  ;;  %vm515_vm4 = vcmp.ge.f32.partialorder %v499_v15, 0.0  ;;  %vm518_vm5 = vcmp.ge.f32.partialorder %v502_v17, 0.0  ;;  %v407_v22 = vpop.f32.mrb[11].mxu0  ;;  %v488_v27 = vmul.f32 %v1875_v20, %v2197_v3 }
 0x1cf   :  { %v532_v24 = vsel %vm516_vm3, 1.4142135, %v1980_v23  ;;  %v531_v25 = vsel %vm515_vm4, 1.4142135, %v1980_v23  ;;  %v534_v26 = vsel %vm518_vm5, 1.4142135, %v1980_v23  ;;  %v505_v32 = vadd.f32 %v2194_v1, %v485_v18 }
 0x1d0   :  { %v548_v28 = vmul.f32 %v532_v24, %v500_v14  ;;  %v547_v29 = vmul.f32 %v531_v25, %v499_v15  ;;  %v550_v30 = vmul.f32 %v534_v26, %v502_v17  ;;  %vm517_vm6 = vcmp.ge.f32.partialorder %v501_v16, 0.0 }
 0x1d1   :  { %v533_v31 = vsel %vm517_vm6, 1.4142135, %v1980_v23  ;;  %vm520_vm7 = vcmp.ge.f32.partialorder %v504_v13, 0.0  ;;  %vm519_vm8 = vcmp.ge.f32.partialorder %v503_v19, 0.0  ;;  %v1878_v33 = vpop.f32.mrb[12].mxu0  ;;  %vm522_vm9 = vcmp.ge.f32.partialorder %v506_v21, 0.0 }
 0x1d2   :  { %v576_v34 = vmul.f32 %v2175_v39, %v548_v28  ;;  %v575_v35 = vmul.f32 %v2175_v39, %v547_v29  ;;  %v549_v36 = vmul.f32 %v533_v31, %v501_v16  ;;  %v417_v37 = vpop.f32.mrb[13].mxu0  ;;  %v578_v38 = vmul.f32 %v2175_v39, %v550_v30 }
 0x1d3   :  { %v536_v41 = vsel %vm520_vm7, 1.4142135, %v1980_v23  ;;  %v535_v42 = vsel %vm519_vm8, 1.4142135, %v1980_v23  ;;  %v508_v44 = vadd.f32 %v2194_v1, %v488_v27  ;;  %vm521_vm10 = vcmp.ge.f32.partialorder %v505_v32, 0.0 }
 0x1d4   :  { %v577_v46 = vmul.f32 %v2175_v39, %v549_v36  ;;  %v551_v47 = vmul.f32 %v535_v42, %v503_v19  ;;  %1893 = vmatprep.mubr.msk.f32.mxu0 %vm33_vm1, %v575_v35  ;;  %v552_v48 = vmul.f32 %v536_v41, %v504_v13  ;;  %v487_v49 = vmul.f32 %v2197_v3, %v407_v22  ;;  %v2275_v35 = vpop.permute.xlu1 %915  ;;  %v2286_v41 = vld [vmem:[%s2709_s3 + $0x48] ss:$0 sm:$0xff]  ;;  %s2477_s3 = spop %1955 }
 0x1d5   :  { %v490_v50 = vmul.f32 %v1878_v33, %v2197_v3  ;;  %v1881_v51 = vpop.f32.mrb[14].mxu0  ;;  %1894 = vmatmul.mubr.msk.f32.vlgmr.msra.gmra.mrb[18].mxu0 %vm33_vm1, %v576_v34  ;;  %v538_v53 = vsel %vm522_vm9, 1.4142135, %v1980_v23  ;;  %v537_v45 = vsel %vm521_vm10, 1.4142135, %v1980_v23  ;;  %vm524_vm11 = vcmp.ge.f32.partialorder %v508_v44, 0.0  ;;  %s2484_s2 = spop %1957 }
 0x1d6   :  { %v579_v52 = vmul.f32 %v2175_v39, %v551_v47  ;;  %1896 = vmatprep.mubr.msk.f32.mxu1 %vm33_vm1, %v577_v46  ;;  %v427_v54 = vpop.f32.mrb[15].mxu0  ;;  %v553_v55 = vmul.f32 %v537_v45, %v505_v32  ;;  %v507_v56 = vadd.f32 %v2194_v1, %v487_v49  ;;  %v489_v58 = vmul.f32 %v2197_v3, %v417_v37  ;;  %s1960_s11 = spop %1959 }
 0x1d7   :  { %v510_v57 = vadd.f32 %v2194_v1, %v490_v50  ;;  %1897 = vmatmul.mubr.msk.f32.vlgmr.msra.gmra.mrb[2].mxu1 %vm33_vm1, %v578_v38  ;;  %v492_v59 = vmul.f32 %v1881_v51, %v2197_v3  ;;  %v491_v60 = vmul.f32 %v2197_v3, %v427_v54  ;;  %v580_v61 = vmul.f32 %v2175_v39, %v552_v48 }
 0x1d8   :  { %1899 = vmatprep.mubr.msk.f32.mxu1 %vm33_vm1, %v579_v52  ;;  %v554_v62 = vmul.f32 %v538_v53, %v506_v21  ;;  %vm523_vm12 = vcmp.ge.f32.partialorder %v507_v56, 0.0  ;;  %v581_v0 = vmul.f32 %v2175_v39, %v553_v55  ;;  %v540_v2 = vsel %vm524_vm11, 1.4142135, %v1980_v23  ;;  %v2277_v36 = vpop.permute.xlu1 %1193 }
 0x1d9   :  { %v1884_v63 = vpop.f32.mrb[16].mxu0  ;;  %v539_v4 = vsel %vm523_vm12, 1.4142135, %v1980_v23  ;;  %v509_v6 = vadd.f32 %v2194_v1, %v489_v58  ;;  %vm526_vm13 = vcmp.ge.f32.partialorder %v510_v57, 0.0  ;;  %v512_v10 = vadd.f32 %v2194_v1, %v492_v59 }
 0x1da   :  { %v437_v7 = vpop.f32.mrb[17].mxu0  ;;  %v555_v9 = vmul.f32 %v539_v4, %v507_v56  ;;  %v511_v11 = vadd.f32 %v2194_v1, %v491_v60  ;;  %v494_v43 = vmul.f32 %v1884_v63, %v2197_v3  ;;  %v582_v14 = vmul.f32 %v2175_v39, %v554_v62 }
 0x1db   :  { %1900 = vmatmul.mubr.msk.f32.gmra.mrb[4].mxu1 %vm33_vm1, %v580_v61  ;;  %vm525_vm14 = vcmp.ge.f32.partialorder %v509_v6, 0.0  ;;  %v493_v12 = vmul.f32 %v2197_v3, %v437_v7  ;;  %v556_v15 = vmul.f32 %v540_v2, %v508_v44  ;;  %v542_v16 = vsel %vm526_vm13, 1.4142135, %v1980_v23 }
 0x1dc   :  { %1902 = vmatprep.mubr.msk.f32.mxu1 %vm33_vm1, %v581_v0  ;;  %v541_v17 = vsel %vm525_vm14, 1.4142135, %v1980_v23  ;;  %v583_v18 = vmul.f32 %v2177_v40, %v555_v9  ;;  %vm527_vm15 = vcmp.ge.f32.partialorder %v511_v11, 0.0  ;;  %vm528_vm0 = vcmp.ge.f32.partialorder %v512_v10, 0.0  ;;  %v2279_v37 = vpop.permute.xlu1 %1454 }
 0x1dd   :  { %v557_v13 = vmul.f32 %v541_v17, %v509_v6  ;;  %v543_v19 = vsel %vm527_vm15, 1.4142135, %v1980_v23  ;;  %v514_v20 = vadd.f32 %v2194_v1, %v494_v43  ;;  %v513_v3 = vadd.f32 %v2194_v1, %v493_v12 }
 0x1de   :  { %v584_v39 = vmul.f32 %v2177_v40, %v556_v15  ;;  %v558_v21 = vmul.f32 %v542_v16, %v510_v57  ;;  %v544_v24 = vsel %vm528_vm0, 1.4142135, %v1980_v23  ;;  %v559_v25 = vmul.f32 %v543_v19, %v511_v11 }
 0x1df   :  { %1903 = vmatmul.mubr.msk.f32.gmra.mrb[6].mxu1 %vm33_vm1, %v582_v14  ;;  %vm529_vm2 = vcmp.ge.f32.partialorder %v513_v3, 0.0  ;;  %v585_v22 = vmul.f32 %v2177_v40, %v557_v13  ;;  %vm530_vm3 = vcmp.ge.f32.partialorder %v514_v20, 0.0  ;;  %v560_v27 = vmul.f32 %v544_v24, %v512_v10  ;;  %v2308_v10 = vpop.permute.xlu0 %917 }
 0x1e0   :  { %1905 = vmatprep.mubr.msk.f32.mxu1 %vm33_vm1, %v583_v18  ;;  %v545_v26 = vsel %vm529_vm2, 1.4142135, %v1980_v23  ;;  %v586_v1 = vmul.f32 %v2177_v40, %v558_v21  ;;  %v587_v28 = vmul.f32 %v2177_v40, %v559_v25  ;;  %v546_v29 = vsel %vm530_vm3, 1.4142135, %v1980_v23  ;;  %v2281_v38 = vpop.permute.xlu1 %1456 }
 0x1e1   :  { %v561_v30 = vmul.f32 %v545_v26, %v513_v3  ;;  %v588_v31 = vmul.f32 %v2177_v40, %v560_v27  ;;  %v562_v32 = vmul.f32 %v546_v29, %v514_v20 }
 0x1e3   :  { %1906 = vmatmul.mubr.msk.f32.gmra.mrb[8].mxu1 %vm33_vm1, %v584_v39  ;;  %v589_v33 = vmul.f32 %v2177_v40, %v561_v30  ;;  %v590_v34 = vmul.f32 %v2177_v40, %v562_v32  ;;  %v2323_v39 = vpop.permute.xlu0 %1195 }
 0x1e4   :  { %1908 = vmatprep.mubr.msk.f32.mxu1 %vm33_vm1, %v585_v22 }
 0x1e7   :  { %1909 = vmatmul.mubr.msk.f32.gmra.mrb[10].mxu1 %vm33_vm1, %v586_v1 }
 0x1e8   :  { %1911 = vmatprep.mubr.msk.f32.mxu1 %vm33_vm1, %v587_v28 }
 0x1eb   :  { %1912 = vmatmul.mubr.msk.f32.gmra.mrb[12].mxu1 %vm33_vm1, %v588_v31 }
 0x1ec   :  { %1914 = vmatprep.mubr.msk.f32.mxu1 %vm33_vm1, %v589_v33 }
 0x1ef   :  { %1915 = vmatmul.mubr.msk.f32.gmra.mrb[14].mxu1 %vm33_vm1, %v590_v34 }
 0x23c   :  { %v2288_v42 = vpop.permute.xlu1 %784 }
 0x23e   :  { %v2334_v28 = vpop.permute.xlu0 %786 }
 0x2a8   :  { %v1895_v44 = vpop.f32.mrb[18].mxu0 }
 0x2a9   :  { %v791_v40 = vmul.f32 %v1895_v44, %v2288_v42  ;;  %v705_v46 = vpop.f32.mrb[19].mxu0 }
 0x2aa   :  { %v1898_v47 = vpop.f32.mrb[2].mxu1  ;;  %v790_v48 = vmul.f32 %v2288_v42, %v705_v46 }
 0x2ab   :  { %v811_v49 = vadd.f32 %v2286_v41, %v791_v40  ;;  %v793_v50 = vmul.f32 %v1898_v47, %v2288_v42  ;;  %v715_v51 = vpop.f32.mrb[3].mxu1 }
 0x2ac   :  { %v810_v52 = vadd.f32 %v2286_v41, %v790_v48  ;;  %v792_v53 = vmul.f32 %v2288_v42, %v715_v51 }
 0x2ad   :  { %vm827_vm4 = vcmp.ge.f32.partialorder %v811_v49, 0.0  ;;  %v813_v45 = vadd.f32 %v2286_v41, %v793_v50 }
 0x2ae   :  { %v843_v54 = vsel %vm827_vm4, 1.4142135, %v1980_v23  ;;  %vm826_vm5 = vcmp.ge.f32.partialorder %v810_v52, 0.0  ;;  %v1901_v55 = vpop.f32.mrb[4].mxu1  ;;  %v812_v58 = vadd.f32 %v2286_v41, %v792_v53 }
 0x2af   :  { %v859_v56 = vmul.f32 %v843_v54, %v811_v49  ;;  %vm829_vm6 = vcmp.ge.f32.partialorder %v813_v45, 0.0  ;;  %v842_v57 = vsel %vm826_vm5, 1.4142135, %v1980_v23  ;;  %v725_v59 = vpop.f32.mrb[5].mxu1  ;;  %v795_v0 = vmul.f32 %v1901_v55, %v2288_v42 }
 0x2b0   :  { %v845_v60 = vsel %vm829_vm6, 1.4142135, %v1980_v23  ;;  %v2301_v62 = vmul.f32 %v842_v57, %v810_v52  ;;  %vm828_vm7 = vcmp.ge.f32.partialorder %v812_v58, 0.0  ;;  %v794_v17 = vmul.f32 %v2288_v42, %v725_v59 }
 0x2b1   :  { %v861_v61 = vmul.f32 %v845_v60, %v813_v45  ;;  %v922_v63 = vmul.f32 %v2275_v35, %v859_v56  ;;  %v1200_v9 = vmul.f32 %v2277_v36, %v859_v56  ;;  %v844_v12 = vsel %vm828_vm7, 1.4142135, %v1980_v23 }
 0x2b2   :  { %v1904_v2 = vpop.f32.mrb[6].mxu1  ;;  %v921_v43 = vmul.f32 %v2275_v35, %v2301_v62  ;;  %v815_v15 = vadd.f32 %v2286_v41, %v795_v0  ;;  %v1461_v13 = vmul.f32 %v2279_v37, %v859_v56  ;;  %v860_v19 = vmul.f32 %v844_v12, %v812_v58 }
 0x2b3   :  { %v735_v4 = vpop.f32.mrb[7].mxu1  ;;  %v924_v6 = vmul.f32 %v2275_v35, %v861_v61  ;;  %v940_v7 = vsel %vm33_vm1, %v922_v63, 0.0  ;;  %v1218_v16 = vsel %vm33_vm1, %v1200_v9, 0.0  ;;  %v1460_v3 = vmul.f32 %v2279_v37, %v2301_v62 }
 0x2b4   :  { %941 = vadd.xlane.f32.xlu0 %v940_v7  ;;  %v937_v20 = vsel %vm33_vm1, %v921_v43, 0.0  ;;  %vm831_vm8 = vcmp.ge.f32.partialorder %v815_v15, 0.0  ;;  %v814_v22 = vadd.f32 %v2286_v41, %v794_v17  ;;  %v1479_v25 = vsel %vm33_vm1, %v1461_v13, 0.0 }
 0x2b5   :  { %v946_v11 = vsel %vm33_vm1, %v924_v6, 0.0  ;;  %v1202_v26 = vmul.f32 %v2277_v36, %v861_v61  ;;  %v1476_v1 = vsel %vm33_vm1, %v1460_v3, 0.0  ;;  %v1201_v27 = vmul.f32 %v2277_v36, %v860_v19 }
 0x2b6   :  { %947 = vadd.xlane.f32.xlu1 %v946_v11  ;;  %v2314_v14 = vpop.f32.mrb[8].mxu1  ;;  %v847_v29 = vsel %vm831_vm8, 1.4142135, %v1980_v23  ;;  %v797_v30 = vmul.f32 %v1904_v2, %v2288_v42  ;;  %vm830_vm9 = vcmp.ge.f32.partialorder %v814_v22, 0.0  ;;  %v1463_v44 = vmul.f32 %v2279_v37, %v861_v61 }
 0x2b7   :  { %v745_v18 = vpop.f32.mrb[9].mxu1  ;;  %v1224_v34 = vsel %vm33_vm1, %v1202_v26, 0.0  ;;  %v863_v46 = vmul.f32 %v847_v29, %v815_v15  ;;  %v1221_v48 = vsel %vm33_vm1, %v1201_v27, 0.0  ;;  %v1462_v49 = vmul.f32 %v2279_v37, %v860_v19 }
 0x2b8   :  { %1219 = vadd.xlane.f32.xlu0 %v1218_v16  ;;  %v846_v50 = vsel %vm830_vm9, 1.4142135, %v1980_v23  ;;  %v796_v51 = vmul.f32 %v2288_v42, %v735_v4  ;;  %v817_v45 = vadd.f32 %v2286_v41, %v797_v30  ;;  %v1485_v56 = vsel %vm33_vm1, %v1463_v44, 0.0 }
 0x2b9   :  { %v923_v57 = vmul.f32 %v2275_v35, %v860_v19  ;;  %v862_v59 = vmul.f32 %v846_v50, %v814_v22  ;;  %v1482_v60 = vsel %vm33_vm1, %v1462_v49, 0.0  ;;  %v926_v61 = vmul.f32 %v2275_v35, %v863_v46 }
 0x2ba   :  { %v2325_v21 = vpop.f32.mrb[10].mxu1  ;;  %938 = vadd.xlane.f32.xlu1 %v937_v20  ;;  %vm833_vm10 = vcmp.ge.f32.partialorder %v817_v45, 0.0  ;;  %v816_v0 = vadd.f32 %v2286_v41, %v796_v51  ;;  %v1199_v4 = vmul.f32 %v2277_v36, %v2301_v62  ;;  %v798_v11 = vmul.f32 %v2334_v28, %v745_v18 }
 0x2bb   :  { %v2328_v24 = vpop.f32.mrb[11].mxu1  ;;  %v943_v2 = vsel %vm33_vm1, %v923_v57, 0.0  ;;  %v952_v6 = vsel %vm33_vm1, %v926_v61, 0.0  ;;  %v1203_v7 = vmul.f32 %v2277_v36, %v862_v59  ;;  %v849_v9 = vsel %vm833_vm10, 1.4142135, %v1980_v23 }
 0x2bc   :  { %1480 = vadd.xlane.f32.xlu0 %v1479_v25  ;;  %vm832_vm11 = vcmp.ge.f32.partialorder %v816_v0, 0.0  ;;  %v1215_v43 = vsel %vm33_vm1, %v1199_v4, 0.0  ;;  %v1204_v12 = vmul.f32 %v2277_v36, %v863_v46  ;;  %v2375_v15 = vmul.f32 %v849_v9, %v817_v45 }
 0x2bd   :  { %v799_v62 = vmul.f32 %v2314_v14, %v2334_v28  ;;  %v1227_v17 = vsel %vm33_vm1, %v1203_v7, 0.0  ;;  %v1464_v16 = vmul.f32 %v2279_v37, %v862_v59  ;;  %v848_v13 = vsel %vm832_vm11, 1.4142135, %v1980_v23 }
 0x2be   :  { %v1913_v31 = vpop.f32.mrb[12].mxu1  ;;  %1477 = vadd.xlane.f32.xlu1 %v1476_v1  ;;  %v818_v19 = vadd.f32 %v2286_v41, %v798_v11  ;;  %v801_v18 = vmul.f32 %v2325_v21, %v2334_v28  ;;  %v1230_v20 = vsel %vm33_vm1, %v1204_v12, 0.0  ;;  %v1465_v3 = vmul.f32 %v2279_v37, %v863_v46 }
 0x2bf   :  { %v803_v32 = vmul.f32 %v1913_v31, %v2334_v28  ;;  %v765_v33 = vpop.f32.mrb[13].mxu1  ;;  %v864_v22 = vmul.f32 %v848_v13, %v816_v0  ;;  %v819_v14 = vadd.f32 %v2286_v41, %v799_v62  ;;  %v1488_v25 = vsel %vm33_vm1, %v1464_v16, 0.0 }
 0x2c0   :  { %v802_v40 = vmul.f32 %v2334_v28, %v765_v33  ;;  %1225 = vadd.xlane.f32.xlu0 %v1224_v34  ;;  %v928_v26 = vmul.f32 %v2275_v35, %v2375_v15  ;;  %vm834_vm12 = vcmp.ge.f32.partialorder %v818_v19, 0.0  ;;  %v821_v1 = vadd.f32 %v2286_v41, %v801_v18 }
 0x2c1   :  { %v2343_v47 = vadd.f32 %v2286_v41, %v803_v32  ;;  %v1491_v27 = vsel %vm33_vm1, %v1465_v3, 0.0  ;;  %v925_v21 = vmul.f32 %v2275_v35, %v862_v59  ;;  %vm835_vm13 = vcmp.ge.f32.partialorder %v819_v14, 0.0 }
 0x2c2   :  { %v2350_v52 = vadd.f32 %v2286_v41, %v802_v40  ;;  %1222 = vadd.xlane.f32.xlu1 %v1221_v48  ;;  %v1916_v53 = vpop.f32.mrb[14].mxu1  ;;  %v958_v29 = vsel %vm33_vm1, %v928_v26, 0.0  ;;  %v1205_v30 = vmul.f32 %v2277_v36, %v864_v22  ;;  %v850_v31 = vsel %vm834_vm12, 1.4142135, %v1980_v23 }
 0x2c3   :  { %v805_v54 = vmul.f32 %v1916_v53, %v2334_v28  ;;  %v775_v55 = vpop.f32.mrb[15].mxu1  ;;  %vm837_vm14 = vcmp.ge.f32.partialorder %v821_v1, 0.0  ;;  %v949_v32 = vsel %vm33_vm1, %v925_v21, 0.0  ;;  %v1206_v33 = vmul.f32 %v2277_v36, %v2375_v15 }
 0x2c4   :  { %v804_v58 = vmul.f32 %v2334_v28, %v775_v55  ;;  %1486 = vadd.xlane.f32.xlu0 %v1485_v56  ;;  %v851_v34 = vsel %vm835_vm13, 1.4142135, %v1980_v23  ;;  %v866_v44 = vmul.f32 %v850_v31, %v818_v19  ;;  %v1233_v40 = vsel %vm33_vm1, %v1205_v30, 0.0 }
 0x2c5   :  { %v2358_v42 = vadd.f32 %v2286_v41, %v805_v54  ;;  %v1466_v46 = vmul.f32 %v2279_v37, %v864_v22  ;;  %v853_v48 = vsel %vm837_vm14, 1.4142135, %v1980_v23  ;;  %v867_v49 = vmul.f32 %v851_v34, %v819_v14 }
 0x2c6   :  { %v2363_v63 = vadd.f32 %v2286_v41, %v804_v58  ;;  %1483 = vadd.xlane.f32.xlu1 %v1482_v60  ;;  %v800_v50 = vmul.f32 %v2334_v28, %v2328_v24  ;;  %v1236_v51 = vsel %vm33_vm1, %v1206_v33, 0.0  ;;  %v927_v53 = vmul.f32 %v2275_v35, %v864_v22 }
 0x2c7   :  { %v869_v36 = vmul.f32 %v853_v48, %v821_v1  ;;  %v1494_v45 = vsel %vm33_vm1, %v1466_v46, 0.0  ;;  %v1468_v54 = vmul.f32 %v2281_v38, %v866_v44  ;;  %v930_v57 = vmul.f32 %v2308_v10, %v867_v49 }
 0x2c8   :  { %944 = vadd.xlane.f32.xlu0 %v943_v2  ;;  %v820_v55 = vadd.f32 %v2286_v41, %v800_v50  ;;  %v955_v56 = vsel %vm33_vm1, %v927_v53, 0.0  ;;  %v1208_v58 = vmul.f32 %v2323_v39, %v867_v49  ;;  %vm839_vm0 = vcmp.ge.f32.partialorder %v2343_v47, 0.0 }
 0x2c9   :  { %v1500_v24 = vsel %vm33_vm1, %v1468_v54, 0.0  ;;  %v932_v28 = vmul.f32 %v2308_v10, %v869_v36  ;;  %v964_v35 = vsel %vm33_vm1, %v930_v57, 0.0  ;;  %v1210_v41 = vmul.f32 %v2323_v39, %v869_v36 }
 0x2ca   :  { %953 = vadd.xlane.f32.xlu1 %v952_v6  ;;  %vm836_vm15 = vcmp.ge.f32.partialorder %v820_v55, 0.0  ;;  %v1242_v61 = vsel %vm33_vm1, %v1208_v58, 0.0  ;;  %v1469_v0 = vmul.f32 %v2281_v38, %v867_v49  ;;  %v1471_v6 = vmul.f32 %v2281_v38, %v869_v36 }
 0x2cb   :  { %v970_v59 = vsel %vm33_vm1, %v932_v28, 0.0  ;;  %v852_v60 = vsel %vm836_vm15, 1.4142135, %v1980_v23  ;;  %v1248_v4 = vsel %vm33_vm1, %v1210_v41, 0.0  ;;  %v855_v7 = vsel %vm839_vm0, 1.4142135, %v1980_v23 }
 0x2cc   :  { %1216 = vadd.xlane.f32.xlu0 %v1215_v43  ;;  %v868_v2 = vmul.f32 %v852_v60, %v820_v55  ;;  %v1503_v9 = vsel %vm33_vm1, %v1469_v0, 0.0  ;;  %v929_v11 = vmul.f32 %v2308_v10, %v866_v44  ;;  %v871_v43 = vmul.f32 %v855_v7, %v2343_v47 }
 0x2cd   :  { %v1509_v12 = vsel %vm33_vm1, %v1471_v6, 0.0  ;;  %v1207_v16 = vmul.f32 %v2323_v39, %v866_v44  ;;  %vm838_vm2 = vcmp.ge.f32.partialorder %v2350_v52, 0.0  ;;  %vm841_vm3 = vcmp.ge.f32.partialorder %v2358_v42, 0.0 }
 0x2ce   :  { %1228 = vadd.xlane.f32.xlu1 %v1227_v17  ;;  %v931_v62 = vmul.f32 %v2308_v10, %v868_v2  ;;  %v961_v17 = vsel %vm33_vm1, %v929_v11, 0.0  ;;  %v934_v19 = vmul.f32 %v2308_v10, %v871_v43  ;;  %v1209_v18 = vmul.f32 %v2323_v39, %v868_v2 }
 0x2cf   :  { %v1239_v47 = vsel %vm33_vm1, %v1207_v16, 0.0  ;;  %v1212_v22 = vmul.f32 %v2323_v39, %v871_v43  ;;  %v857_v14 = vsel %vm841_vm3, 1.4142135, %v1980_v23  ;;  %v1470_v1 = vmul.f32 %v2281_v38, %v868_v2 }
 0x2d0   :  { %1231 = vadd.xlane.f32.xlu0 %v1230_v20  ;;  %v967_v13 = vsel %vm33_vm1, %v931_v62, 0.0  ;;  %v854_v20 = vsel %vm838_vm2, 1.4142135, %v1980_v23  ;;  %v976_v3 = vsel %vm33_vm1, %v934_v19, 0.0  ;;  %v1245_v26 = vsel %vm33_vm1, %v1209_v18, 0.0 }
 0x2d1   :  { %v1254_v21 = vsel %vm33_vm1, %v1212_v22, 0.0  ;;  %v1506_v30 = vsel %vm33_vm1, %v1470_v1, 0.0  ;;  %vm840_vm4 = vcmp.ge.f32.partialorder %v2363_v63, 0.0  ;;  %v1467_v57 = vmul.f32 %v2279_v37, %v2375_v15 }
 0x2d2   :  { %1489 = vadd.xlane.f32.xlu1 %v1488_v25  ;;  %v870_v25 = vmul.f32 %v854_v20, %v2350_v52  ;;  %v856_v34 = vsel %vm840_vm4, 1.4142135, %v1980_v23  ;;  %v2482_v28 = vand.u32 127, %v208_v5  ;;  %v2487_v15 = vstv %s1960_s11 }
 0x2d3   :  { %v872_v46 = vmul.f32 %v856_v34, %v2363_v63  ;;  %v2512_v22 = vstv %s2484_s2  ;;  %vm1072_vm5 = vcmask 195712   ;;  %vm1079_vm6 = vcmask 261312  }
 0x2d4   :  { %1492 = vadd.xlane.f32.xlu0 %v1491_v27  ;;  %v873_v27 = vmul.f32 %v857_v14, %v2358_v42  ;;  %v933_v31 = vmul.f32 %v2308_v10, %v870_v25  ;;  %v1211_v42 = vmul.f32 %v2323_v39, %v870_v25  ;;  %v1472_v49 = vmul.f32 %v2281_v38, %v870_v25 }
 0x2d5   :  { %v935_v53 = vmul.f32 %v2308_v10, %v872_v46  ;;  %v1474_v55 = vmul.f32 %v2281_v38, %v872_v46  ;;  %v1060_v37 = vadd.s32 4294967288, %v2482_v28  ;;  %v2496_v2 = vsub.s32 %v2482_v28, %v2029_v8 }
 0x2d6   :  { %959 = vadd.xlane.f32.xlu1 %v958_v29  ;;  %v1473_v29 = vmul.f32 %v2281_v38, %v871_v43  ;;  %v973_v33 = vsel %vm33_vm1, %v933_v31, 0.0  ;;  %v1251_v48 = vsel %vm33_vm1, %v1211_v42, 0.0  ;;  %v1512_v23 = vsel %vm33_vm1, %v1472_v49, 0.0 }
 0x2d7   :  { %v979_v63 = vsel %vm33_vm1, %v935_v53, 0.0  ;;  %v2491_v60 = vsub.s32 %v1060_v37, %v2029_v8  ;;  %v1074_v11 = vadd.s32 4294967272, %v2482_v28  ;;  %v1067_v62 = vadd.s32 4294967280, %v2482_v28 }
 0x2d8   :  { %950 = vadd.xlane.f32.xlu0 %v949_v32  ;;  %v1515_v52 = vsel %vm33_vm1, %v1473_v29, 0.0  ;;  %v936_v32 = vmul.f32 %v2308_v10, %v873_v27  ;;  %v1497_v10 = vsel %vm33_vm1, %v1467_v57, 0.0  ;;  %vm1086_vm7 = vcmask 326912  }
 0x2d9   :  { %v2509_v20 = vsub.s32 %v1067_v62, %v2029_v8  ;;  %vm1093_vm8 = vcmask 392512   ;;  %vm1100_vm9 = vcmask 458112   ;;  %vm1107_vm10 = vcmask 523712  }
 0x2da   :  { %1234 = vadd.xlane.f32.xlu1 %v1233_v40  ;;  %v982_v44 = vsel %vm33_vm1, %v936_v32, 0.0  ;;  %v1214_v40 = vmul.f32 %v2323_v39, %v873_v27  ;;  %vm1150_vm11 = vcmask 516096  }
 0x2dc   :  { %1237 = vadd.xlane.f32.xlu0 %v1236_v51  ;;  %v1260_v50 = vsel %vm33_vm1, %v1214_v40, 0.0  ;;  %v1475_v51 = vmul.f32 %v2281_v38, %v873_v27 }
 0x2de   :  { %1495 = vadd.xlane.f32.xlu1 %v1494_v45  ;;  %v1521_v36 = vsel %vm33_vm1, %v1475_v51, 0.0  ;;  %v1213_v45 = vmul.f32 %v2323_v39, %v872_v46  ;;  %v2527_v46 = vstv %s2477_s3 }
 0x2e0   :  { %956 = vadd.xlane.f32.xlu0 %v955_v56  ;;  %v1257_v54 = vsel %vm33_vm1, %v1213_v45, 0.0  ;;  %v1518_v56 = vsel %vm33_vm1, %v1474_v55, 0.0  ;;  %vm1065_vm1 = vcmask 130112  }
 0x2e2   :  { %1501 = vadd.xlane.f32.xlu1 %v1500_v24 }
 0x2e4   :  { %965 = vadd.xlane.f32.xlu0 %v964_v35 }
 0x2e6   :  { %971 = vadd.xlane.f32.xlu1 %v970_v59 }
 0x2e8   :  { %1243 = vadd.xlane.f32.xlu0 %v1242_v61 }
 0x2ea   :  { %1249 = vadd.xlane.f32.xlu1 %v1248_v4 }
 0x2ec   :  { %1504 = vadd.xlane.f32.xlu0 %v1503_v9 }
 0x2ee   :  { %1510 = vadd.xlane.f32.xlu1 %v1509_v12 }
 0x2f0   :  { %962 = vadd.xlane.f32.xlu0 %v961_v17 }
 0x2f2   :  { %968 = vadd.xlane.f32.xlu1 %v967_v13 }
 0x2f4   :  { %1240 = vadd.xlane.f32.xlu0 %v1239_v47  ;;  %v2506_v47 = vsub.s32 %v1074_v11, %v2029_v8 }
 0x2f6   :  { %977 = vadd.xlane.f32.xlu1 %v976_v3 }
 0x2f8   :  { %1246 = vadd.xlane.f32.xlu0 %v1245_v26 }
 0x2fa   :  { %1255 = vadd.xlane.f32.xlu1 %v1254_v21 }
 0x2fc   :  { %1507 = vadd.xlane.f32.xlu0 %v1506_v30 }
 0x2fe   :  { %1516 = vadd.xlane.f32.xlu1 %v1515_v52 }
 0x300   :  { %974 = vadd.xlane.f32.xlu0 %v973_v33  ;;  %v1088_v33 = vadd.s32 4294967256, %v2482_v28 }
 0x302   :  { %983 = vadd.xlane.f32.xlu1 %v982_v44  ;;  %v1081_v44 = vadd.s32 4294967264, %v2482_v28 }
 0x304   :  { %1252 = vadd.xlane.f32.xlu0 %v1251_v48  ;;  %v2540_v55 = vsub.s32 %v1081_v44, %v2029_v8 }
 0x306   :  { %1261 = vadd.xlane.f32.xlu1 %v1260_v50 }
 0x308   :  { %1513 = vadd.xlane.f32.xlu0 %v1512_v23 }
 0x30a   :  { %1522 = vadd.xlane.f32.xlu1 %v1521_v36  ;;  %v2534_v36 = vsub.s32 %v1088_v33, %v2029_v8 }
 0x30c   :  { %980 = vadd.xlane.f32.xlu0 %v979_v63 }
 0x310   :  { %1258 = vadd.xlane.f32.xlu0 %v1257_v54 }
 0x314   :  { %1519 = vadd.xlane.f32.xlu0 %v1518_v56 }
 0x318   :  { %1498 = vadd.xlane.f32.xlu0 %v1497_v10 }
 0x341   :  { %v2475_v24 = vpop.xlane.xlu0 %941 }
 0x342   :  { %v991_v45 = vadd.f32 %v2527_v46, %v2475_v24  ;;  %v1095_v24 = vadd.s32 4294967248, %v2482_v28 }
 0x343   :  { %v2479_v39 = vpop.xlane.xlu1 %947 }
 0x345   :  { %v1220_v38 = vpop.xlane.xlu0 %1219 }
 0x346   :  { %v1269_v26 = vadd.f32 %v2512_v22, %v1220_v38 }
 0x347   :  { %v939_v35 = vpop.xlane.xlu1 %938 }
 0x348   :  { %v1738_v32 = vclamps-f32 %v1269_v26, 1.0  ;;  %v990_v49 = vadd.f32 %v2527_v46, %v939_v35 }
 0x349   :  { %v1481_v58 = vpop.xlane.xlu0 %1480 }
 0x34a   :  { %v1530_v59 = vadd.f32 %v2487_v15, %v1481_v58  ;;  %v1339_v53 = vrot.slane %v1738_v32, %v2491_v60  ;;  %v1721_v58 = vclamps-f32 %v990_v49, 1.0 }
 0x34b   :  { %v1478_v41 = vpop.xlane.xlu1 %1477 }
 0x34c   :  { %v1754_v61 = vclamps-f32 %v1530_v59, 1.0  ;;  %v1529_v5 = vadd.f32 %v2487_v15, %v1478_v41 }
 0x34d   :  { %v1226_v0 = vpop.xlane.xlu0 %1225 }
 0x34e   :  { %v1600_v4 = vrot.slane %v1754_v61, %v2491_v60  ;;  %v1753_v6 = vclamps-f32 %v1529_v5, 1.0  ;;  %v1271_v34 = vadd.f32 %v2512_v22, %v1226_v0  ;;  %v993_v5 = vadd.f32 %v2527_v46, %v2479_v39 }
 0x34f   :  { %v1223_v7 = vpop.xlane.xlu1 %1222  ;;  %v1059_v39 = vrot.slane %v1721_v58, %v2496_v2 }
 0x350   :  { %v1596_v9 = vrot.slane %v1753_v6, %v2496_v2  ;;  %v1270_v30 = vadd.f32 %v2512_v22, %v1223_v7  ;;  %v1740_v54 = vclamps-f32 %v1271_v34, 1.0  ;;  %v1102_v6 = vadd.s32 4294967240, %v2482_v28 }
 0x351   :  { %v1487_v43 = vpop.xlane.xlu0 %1486  ;;  %v1722_v7 = vclamps-f32 %v991_v45, 1.0  ;;  %v2560_v28 = vsub.s32 %v1095_v24, %v2029_v8 }
 0x352   :  { %v1601_v12 = vsel %vm1065_vm1, %v1600_v4, %v1596_v9  ;;  %v1532_v17 = vadd.f32 %v2487_v15, %v1487_v43  ;;  %v1739_v50 = vclamps-f32 %v1270_v30, 1.0  ;;  %v1349_v9 = vrot.slane %v1740_v54, %v2506_v47 }
 0x353   :  { %v1484_v16 = vpop.xlane.xlu1 %1483  ;;  %v2573_v32 = vsub.s32 %v1102_v6, %v2029_v8 }
 0x354   :  { %v1756_v13 = vclamps-f32 %v1532_v17, 1.0  ;;  %v1531_v19 = vadd.f32 %v2487_v15, %v1484_v16  ;;  %v1344_v59 = vrot.slane %v1739_v50, %v2509_v20 }
 0x355   :  { %v945_v18 = vpop.xlane.xlu0 %944 }
 0x356   :  { %v1755_v3 = vclamps-f32 %v1531_v19, 1.0  ;;  %v1610_v14 = vrot.slane %v1756_v13, %v2506_v47  ;;  %v992_v51 = vadd.f32 %v2527_v46, %v945_v18 }
 0x357   :  { %v2515_v25 = vpop.xlane.xlu1 %953 }
 0x358   :  { %v1605_v1 = vrot.slane %v1755_v3, %v2509_v20  ;;  %v1723_v41 = vclamps-f32 %v992_v51, 1.0 }
 0x359   :  { %v1217_v27 = vpop.xlane.xlu0 %1216 }
 0x35a   :  { %v1606_v21 = vsel %vm1072_vm5, %v1605_v1, %v1601_v12  ;;  %v1268_v29 = vadd.f32 %v2512_v22, %v1217_v27  ;;  %v1071_v19 = vrot.slane %v1723_v41, %v2509_v20  ;;  %v1724_v27 = vclamps-f32 %v993_v5, 1.0 }
 0x35b   :  { %v1229_v31 = vpop.xlane.xlu1 %1228  ;;  %v1611_v52 = vsel %vm1079_vm6, %v1610_v14, %v1606_v21  ;;  %v1064_v21 = vrot.slane %v1722_v7, %v2491_v60 }
 0x35c   :  { %v1737_v42 = vclamps-f32 %v1268_v29, 1.0  ;;  %v1272_v56 = vadd.f32 %v2512_v22, %v1229_v31  ;;  %v995_v29 = vadd.f32 %v2527_v46, %v2515_v25  ;;  %v1078_v51 = vrot.slane %v1724_v27, %v2506_v47 }
 0x35d   :  { %v1232_v40 = vpop.xlane.xlu0 %1231  ;;  %v1066_v34 = vsel %vm1065_vm1, %v1064_v21, %v1059_v39 }
 0x35e   :  { %v1335_v48 = vrot.slane %v1737_v42, %v2496_v2  ;;  %v1273_v38 = vadd.f32 %v2512_v22, %v1232_v40  ;;  %v1741_v43 = vclamps-f32 %v1272_v56, 1.0  ;;  %v1073_v25 = vsel %vm1072_vm5, %v1071_v19, %v1066_v34 }
 0x35f   :  { %v1490_v23 = vpop.xlane.xlu1 %1489 }
 0x360   :  { %v1533_v63 = vadd.f32 %v2487_v15, %v1490_v23  ;;  %v1340_v10 = vsel %vm1065_vm1, %v1339_v53, %v1335_v48  ;;  %v1742_v62 = vclamps-f32 %v1273_v38, 1.0  ;;  %v1354_v30 = vrot.slane %v1741_v43, %v2540_v55 }
 0x361   :  { %v1493_v57 = vpop.xlane.xlu0 %1492  ;;  %v1345_v11 = vsel %vm1072_vm5, %v1344_v59, %v1340_v10  ;;  %v1726_v23 = vclamps-f32 %v995_v29, 1.0 }
 0x362   :  { %v1757_v35 = vclamps-f32 %v1533_v63, 1.0  ;;  %v1534_v37 = vadd.f32 %v2487_v15, %v1493_v57  ;;  %v1350_v3 = vsel %vm1079_vm6, %v1349_v9, %v1345_v11  ;;  %v1080_v57 = vsel %vm1079_vm6, %v1078_v51, %v1073_v25 }
 0x363   :  { %v960_v61 = vpop.xlane.xlu1 %959  ;;  %v1355_v44 = vsel %vm1086_vm7, %v1354_v30, %v1350_v3  ;;  %v1092_v59 = vrot.slane %v1726_v23, %v2534_v36 }
 0x364   :  { %v1615_v0 = vrot.slane %v1757_v35, %v2540_v55  ;;  %v1758_v4 = vclamps-f32 %v1534_v37, 1.0  ;;  %v997_v40 = vadd.f32 %v2527_v46, %v960_v61 }
 0x365   :  { %v951_v12 = vpop.xlane.xlu0 %950 }
 0x366   :  { %v1616_v17 = vsel %vm1086_vm7, %v1615_v0, %v1611_v52  ;;  %v1620_v16 = vrot.slane %v1758_v4, %v2534_v36  ;;  %v994_v13 = vadd.f32 %v2527_v46, %v951_v12  ;;  %v1359_v52 = vrot.slane %v1742_v62, %v2534_v36 }
 0x367   :  { %v1235_v18 = vpop.xlane.xlu1 %1234  ;;  %v1728_v56 = vclamps-f32 %v997_v40, 1.0 }
 0x368   :  { %v2564_v14 = vsel %vm1093_vm8, %v1620_v16, %v1616_v17  ;;  %v1725_v26 = vclamps-f32 %v994_v13, 1.0  ;;  %v1274_v1 = vadd.f32 %v2512_v22, %v1235_v18  ;;  %v1360_v63 = vsel %vm1093_vm8, %v1359_v52, %v1355_v44 }
 0x369   :  { %v1238_v31 = vpop.xlane.xlu0 %1237  ;;  %v1106_v24 = vrot.slane %v1728_v56, %v2573_v32 }
 0x36a   :  { %v1743_v33 = vclamps-f32 %v1274_v1, 1.0  ;;  %v1275_v42 = vadd.f32 %v2512_v22, %v1238_v31  ;;  %v1085_v49 = vrot.slane %v1725_v26, %v2540_v55 }
 0x36b   :  { %v2579_v48 = vpop.xlane.xlu1 %1495 }
 0x36c   :  { %v1364_v50 = vrot.slane %v1743_v33, %v2560_v28  ;;  %v1744_v8 = vclamps-f32 %v1275_v42, 1.0  ;;  %v1087_v35 = vsel %vm1086_vm7, %v1085_v49, %v1080_v57  ;;  %v2624_v57 = vadd.f32 %v2487_v15, %v2579_v48 }
 0x36d   :  { %v957_v53 = vpop.xlane.xlu0 %956  ;;  %v1094_v5 = vsel %vm1093_vm8, %v1092_v59, %v1087_v35 }
 0x36e   :  { %v1369_v45 = vrot.slane %v1744_v8, %v2573_v32  ;;  %v996_v54 = vadd.f32 %v2527_v46, %v957_v53  ;;  %v1365_v10 = vsel %vm1100_vm9, %v1364_v50, %v1360_v63 }
 0x36f   :  { %v1502_v38 = vpop.xlane.xlu1 %1501 }
 0x370   :  { %v1370_v37 = vsel %vm1107_vm10, %v1369_v45, %v1365_v10  ;;  %v1727_v58 = vclamps-f32 %v996_v54, 1.0  ;;  %v1537_v29 = vadd.f32 %v2487_v15, %v1502_v38 }
 0x371   :  { %1412 = vst.msk [vmem:[%s2711_s6 + $0x1] sm:$0x1] %vm1150_vm11, %v1370_v37  ;;  %v966_v41 = vpop.xlane.xlu0 %965 }
 0x372   :  { %v1099_v61 = vrot.slane %v1727_v58, %v2560_v28  ;;  %v999_v3 = vadd.f32 %v2527_v46, %v966_v41  ;;  %v1761_v51 = vclamps-f32 %v1537_v29, 1.0 }
 0x373   :  { %v972_v0 = vpop.xlane.xlu1 %971 }
 0x374   :  { %v1101_v4 = vsel %vm1100_vm9, %v1099_v61, %v1094_v5  ;;  %v1730_v31 = vclamps-f32 %v999_v3, 1.0  ;;  %v1001_v52 = vadd.f32 %v2527_v46, %v972_v0 }
 0x375   :  { %v1108_v6 = vsel %vm1107_vm10, %v1106_v24, %v1101_v4  ;;  %v1244_v7 = vpop.xlane.xlu0 %1243  ;;  %v1635_v24 = vrot.slane %v1761_v51, %v2496_v2 }
 0x376   :  { %1151 = vst.msk [vmem:[%s2711_s6] sm:$0x1] %vm1150_vm11, %v1108_v6  ;;  %v1277_v33 = vadd.f32 %v2512_v22, %v1244_v7  ;;  %v1116_v63 = vrot.slane %v1730_v31, %v2491_v60  ;;  %v1732_v45 = vclamps-f32 %v1001_v52, 1.0 }
 0x377   :  { %v1250_v9 = vpop.xlane.xlu1 %1249 }
 0x378   :  { %v1279_v25 = vadd.f32 %v2512_v22, %v1250_v9  ;;  %v1746_v54 = vclamps-f32 %v1277_v33, 1.0  ;;  %v1126_v6 = vrot.slane %v1732_v45, %v2506_v47 }
 0x379   :  { %v1505_v11 = vpop.xlane.xlu0 %1504 }
 0x37a   :  { %v1538_v49 = vadd.f32 %v2487_v15, %v1505_v11  ;;  %v1748_v37 = vclamps-f32 %v1279_v25, 1.0  ;;  %v1378_v7 = vrot.slane %v1746_v54, %v2491_v60 }
 0x37b   :  { %v1511_v43 = vpop.xlane.xlu1 %1510 }
 0x37c   :  { %v1762_v58 = vclamps-f32 %v1538_v49, 1.0  ;;  %v1540_v5 = vadd.f32 %v2487_v15, %v1511_v43  ;;  %v1388_v43 = vrot.slane %v1748_v37, %v2506_v47 }
 0x37d   :  { %v963_v12 = vpop.xlane.xlu0 %962 }
 0x37e   :  { %v998_v19 = vadd.f32 %v2527_v46, %v963_v12  ;;  %v1764_v3 = vclamps-f32 %v1540_v5, 1.0 }
 0x37f   :  { %v969_v62 = vpop.xlane.xlu1 %968 }
 0x380   :  { %v1000_v1 = vadd.f32 %v2527_v46, %v969_v62  ;;  %v1729_v27 = vclamps-f32 %v998_v19, 1.0 }
 0x381   :  { %v1241_v17 = vpop.xlane.xlu0 %1240 }
 0x382   :  { %v1276_v30 = vadd.f32 %v2512_v22, %v1241_v17  ;;  %v1731_v34 = vclamps-f32 %v1000_v1, 1.0  ;;  %v1112_v50 = vrot.slane %v1729_v27, %v2496_v2 }
 0x383   :  { %v978_v16 = vpop.xlane.xlu1 %977 }
 0x384   :  { %v1745_v23 = vclamps-f32 %v1276_v30, 1.0  ;;  %v1121_v10 = vrot.slane %v1731_v34, %v2509_v20  ;;  %v1117_v59 = vsel %vm1065_vm1, %v1116_v63, %v1112_v50  ;;  %v1003_v41 = vadd.f32 %v2527_v46, %v978_v16 }
 0x385   :  { %v1247_v13 = vpop.xlane.xlu0 %1246 }
 0x386   :  { %v1278_v42 = vadd.f32 %v2512_v22, %v1247_v13  ;;  %v1374_v0 = vrot.slane %v1745_v23, %v2496_v2  ;;  %v1122_v12 = vsel %vm1072_vm5, %v1121_v10, %v1117_v59  ;;  %v1639_v2 = vrot.slane %v1762_v58, %v2491_v60 }
 0x387   :  { %v1256_v39 = vpop.xlane.xlu1 %1255  ;;  %v1734_v13 = vclamps-f32 %v1003_v41, 1.0  ;;  %v1127_v30 = vsel %vm1079_vm6, %v1126_v6, %v1122_v12  ;;  %v1759_v59 = vclamps-f32 %v2624_v57, 1.0 }
 0x388   :  { %v1747_v56 = vclamps-f32 %v1278_v42, 1.0  ;;  %v1281_v19 = vadd.f32 %v2512_v22, %v1256_v39  ;;  %v1379_v1 = vsel %vm1065_vm1, %v1378_v7, %v1374_v0 }
 0x389   :  { %v1508_v18 = vpop.xlane.xlu0 %1507  ;;  %v1625_v12 = vrot.slane %v1759_v59, %v2560_v28 }
 0x38a   :  { %v1539_v53 = vadd.f32 %v2487_v15, %v1508_v18  ;;  %v1383_v9 = vrot.slane %v1747_v56, %v2509_v20 }
 0x38b   :  { %v2608_v26 = vpop.xlane.xlu1 %1516 }
 0x38c   :  { %v1763_v48 = vclamps-f32 %v1539_v53, 1.0  ;;  %v1384_v29 = vsel %vm1072_vm5, %v1383_v9, %v1379_v1 }
 0x38d   :  { %v975_v21 = vpop.xlane.xlu0 %974  ;;  %v1389_v50 = vsel %vm1079_vm6, %v1388_v43, %v1384_v29 }
 0x38e   :  { %v1002_v44 = vadd.f32 %v2527_v46, %v975_v21  ;;  %v1644_v27 = vrot.slane %v1763_v48, %v2509_v20  ;;  %v1136_v20 = vrot.slane %v1734_v13, %v2534_v36 }
 0x38f   :  { %v984_v40 = vpop.xlane.xlu1 %983 }
 0x390   :  { %v1733_v38 = vclamps-f32 %v1002_v44, 1.0  ;;  %v1005_v11 = vadd.f32 %v2527_v46, %v984_v40  ;;  %v1640_v44 = vsel %vm1065_vm1, %v1639_v2, %v1635_v24  ;;  %v1750_v40 = vclamps-f32 %v1281_v19, 1.0 }
 0x391   :  { %v1253_v8 = vpop.xlane.xlu0 %1252  ;;  %v1645_v49 = vsel %vm1072_vm5, %v1644_v27, %v1640_v44 }
 0x392   :  { %v1280_v35 = vadd.f32 %v2512_v22, %v1253_v8  ;;  %v1131_v62 = vrot.slane %v1733_v38, %v2540_v55  ;;  %v1736_v31 = vclamps-f32 %v1005_v11, 1.0  ;;  %v1649_v38 = vrot.slane %v1764_v3, %v2506_v47 }
 0x393   :  { %v1262_v4 = vpop.xlane.xlu1 %1261 }
 0x394   :  { %v1749_v17 = vclamps-f32 %v1280_v35, 1.0  ;;  %v1283_v52 = vadd.f32 %v2512_v22, %v1262_v4  ;;  %v1132_v60 = vsel %vm1086_vm7, %v1131_v62, %v1127_v30  ;;  %v1146_v23 = vrot.slane %v1736_v31, %v2573_v32 }
 0x395   :  { %v1514_v61 = vpop.xlane.xlu0 %1513  ;;  %v1137_v45 = vsel %vm1093_vm8, %v1136_v20, %v1132_v60  ;;  %v1398_v35 = vrot.slane %v1750_v40, %v2534_v36  ;;  %v1650_v47 = vsel %vm1079_vm6, %v1649_v38, %v1645_v49 }
 0x396   :  { %v1541_v16 = vadd.f32 %v2487_v15, %v1514_v61  ;;  %v1393_v33 = vrot.slane %v1749_v17, %v2540_v55  ;;  %v1752_v53 = vclamps-f32 %v1283_v52, 1.0 }
 0x397   :  { %v1523_v42 = vpop.xlane.xlu1 %1522 }
 0x398   :  { %v1765_v39 = vclamps-f32 %v1541_v16, 1.0  ;;  %v1544_v63 = vadd.f32 %v2487_v15, %v1523_v42  ;;  %v1394_v54 = vsel %vm1086_vm7, %v1393_v33, %v1389_v50  ;;  %v1408_v61 = vrot.slane %v1752_v53, %v2573_v32 }
 0x399   :  { %v981_v18 = vpop.xlane.xlu0 %980  ;;  %v1399_v5 = vsel %vm1093_vm8, %v1398_v35, %v1394_v54 }
 0x39a   :  { %v1004_v21 = vadd.f32 %v2527_v46, %v981_v18  ;;  %v1542_v46 = vadd.f32 %v2487_v15, %v2608_v26  ;;  %v1654_v26 = vrot.slane %v1765_v39, %v2540_v55  ;;  %v1768_v24 = vclamps-f32 %v1544_v63, 1.0 }
 0x39c   :  { %v1735_v34 = vclamps-f32 %v1004_v21, 1.0  ;;  %v1766_v37 = vclamps-f32 %v1542_v46, 1.0  ;;  %v1655_v0 = vsel %vm1086_vm7, %v1654_v26, %v1650_v47  ;;  %v1669_v62 = vrot.slane %v1768_v24, %v2573_v32 }
 0x39d   :  { %v1259_v25 = vpop.xlane.xlu0 %1258 }
 0x39e   :  { %v1141_v8 = vrot.slane %v1735_v34, %v2560_v28  ;;  %v1282_v51 = vadd.f32 %v2512_v22, %v1259_v25  ;;  %v1659_v4 = vrot.slane %v1766_v37, %v2534_v36 }
 0x3a0   :  { %v1142_v56 = vsel %vm1100_vm9, %v1141_v8, %v1137_v45  ;;  %v1751_v10 = vclamps-f32 %v1282_v51, 1.0  ;;  %v1660_v17 = vsel %vm1093_vm8, %v1659_v4, %v1655_v0 }
 0x3a1   :  { %v1147_v22 = vsel %vm1107_vm10, %v1146_v23, %v1142_v56  ;;  %v1520_v58 = vpop.xlane.xlu0 %1519 }
 0x3a2   :  { %1152 = vst.msk [vmem:[%s2711_s6 + $0x4] sm:$0x1] %vm1150_vm11, %v1147_v22  ;;  %v1403_v55 = vrot.slane %v1751_v10, %v2560_v28  ;;  %v1543_v41 = vadd.f32 %v2487_v15, %v1520_v58 }
 0x3a4   :  { %v1404_v57 = vsel %vm1100_vm9, %v1403_v55, %v1399_v5  ;;  %v1767_v48 = vclamps-f32 %v1543_v41, 1.0 }
 0x3a5   :  { %v1409_v6 = vsel %vm1107_vm10, %v1408_v61, %v1404_v57  ;;  %v1499_v7 = vpop.xlane.xlu0 %1498 }
 0x3a6   :  { %1413 = vst.msk [vmem:[%s2711_s6 + $0x5] sm:$0x1] %vm1150_vm11, %v1409_v6  ;;  %v1664_v9 = vrot.slane %v1767_v48, %v2560_v28  ;;  %v1536_v11 = vadd.f32 %v2487_v15, %v1499_v7  ;;  %v1626_v15 = vsel %vm1100_vm9, %v1625_v12, %v2564_v14 }
 0x3a8   :  { %v1665_v36 = vsel %vm1100_vm9, %v1664_v9, %v1660_v17  ;;  %v1760_v16 = vclamps-f32 %v1536_v11, 1.0 }
 0x3a9   :  { %v1670_v43 = vsel %vm1107_vm10, %v1669_v62, %v1665_v36 }
 0x3aa   :  { %1674 = vst.msk [vmem:[%s2711_s6 + $0x6] sm:$0x1] %vm1150_vm11, %v1670_v43  ;;  %v1630_v2 = vrot.slane %v1760_v16, %v2573_v32 }
 0x3ac   :  { %v1631_v28 = vsel %vm1107_vm10, %v1630_v2, %v1626_v15 }
 0x3ad   :  { %1673 = vst.msk [vmem:[%s2711_s6 + $0x2] sm:$0x1] %vm1150_vm11, %v1631_v28 }

</bundles_post_ra>
